<compile_context>
chip_gen: v5e
topology: v5e:2x2
jax: 0.10.0
libtpu: 0.0.40
codegen_flags: <defaults>
</compile_context>

<pallas_src>
import functools

import jax
import jax.numpy as jnp
from jax import lax
from jax.experimental import pallas as pl
from jax.experimental.pallas import tpu as pltpu


# ----------------------------------- kernel -------------------------------- #

def _nb1d_kernel(dil, th, true_h,
                 xa_ref, xb_ref,
                 w1_ref, b1_ref, w2_ref, b2_ref,
                 w3_ref, b3_ref, w4_ref, b4_ref,
                 o_ref):
    d = dil
    p = d + 1
    E = th + 2 * d                      # rows of the intermediate activation

    i = pl.program_id(1)                # H-tile index

    # Stitch the two blocked inputs into the (th + 2p)-row halo-extended tile.
    x_ext = jnp.concatenate([xa_ref[0], xb_ref[0][: 2 * p]], axis=0)  # f32
    _, W, C = x_ext.shape

    def conv(slab, w_ref, b_ref):
        """Fused 3-tap conv: (R, W, 3C) slab -> one bf16 MXU matmul -> f32."""
        R = slab.shape[0]
        y = jnp.dot(slab.reshape(R * W, 3 * C).astype(jnp.bfloat16),
                    w_ref[...],
                    preferred_element_type=jnp.float32)
        return y.reshape(R, W, C) + b_ref[...].reshape(1, 1, C)

    def w_slab(y, dd):
        """Fused operand for a 1x3 conv (dilation dd) along W (zero padded)."""
        R = y.shape[0]
        z = jnp.zeros((R, dd, C), y.dtype)
        left = jnp.concatenate([z, y[:, : W - dd, :]], axis=1)    # y[:, w-dd]
        right = jnp.concatenate([y[:, dd:, :], z], axis=1)        # y[:, w+dd]
        return jnp.concatenate([left, y, right], axis=-1)         # (R, W, 3C)

    # conv3x1_1 + ReLU.  Halo rows carry real data / image-edge zeros, so the
    # three H taps are plain static slices (no zero-padded temporaries).
    slab = jnp.concatenate([x_ext[0:E], x_ext[1:E + 1], x_ext[2:E + 2]],
                           axis=-1)
    y = jnp.maximum(conv(slab, w1_ref, b1_ref), 0.0)              # (E, W, C)

    # conv1x3_1 + folded bn1 + ReLU.
    y = jnp.maximum(conv(w_slab(y, 1), w2_ref, b2_ref), 0.0)

    # conv3x1_2's zero padding applies to *this* tensor at the true image
    # edges: zero any halo row whose global index falls outside [0, H).
    g = i * th - d + lax.broadcasted_iota(jnp.int32, (E, W), 0)
    valid = ((g >= 0) & (g < true_h)).astype(y.dtype)[:, :, None]
    y = y * valid

    # conv3x1_2 (dilated) + ReLU.
    slab = jnp.concatenate([y[0:th], y[d:th + d], y[2 * d:th + 2 * d]],
                           axis=-1)
    y = jnp.maximum(conv(slab, w3_ref, b3_ref), 0.0)              # (th, W, C)

    # conv1x3_2 (dilated) + folded bn2.
    y = conv(w_slab(y, d), w4_ref, b4_ref)

    # Dropout2d is identity in eval mode.
    # TODO(synk): training-mode Dropout2d (channel dropout) not implemented.
    o_ref[0] = jnp.maximum(y + x_ext[p:p + th], 0.0).astype(o_ref.dtype)


# ----------------------------------- wrapper ------------------------------- #

def non_bottleneck_1d_pallas_nhwc(x_nhwc, params, dilated, *, block_h=None):
    """x_nhwc: (N, H, W, C) float32. Returns (N, H, W, C)."""
    N, H, W, C = x_nhwc.shape
    d = int(dilated)
    p = d + 1

    if block_h is None:
        block_h = 128                     # per-step H tile (fits v7x/v5e VMEM)
    th = max(int(block_h), 2 * p)         # two-block halo scheme needs th>=2p
    th = min(th, max(H, 2 * p))
    nH = pl.cdiv(H, th)

    w1, b1, w2, b2, s1, t1, w3, b3, w4, b4, s2, t2 = params

    # Fold the eval-mode BN affine into the preceding conv weights / biases.
    w2f = w2 * s1.reshape(1, 1, C)
    b2f = b2 * s1 + t1
    w4f = w4 * s2.reshape(1, 1, C)
    b4f = b4 * s2 + t2

    def fuse(w):   # (3, Cin, Cout) -> (3*Cin, Cout), bf16 for the fused matmul
        return w.reshape(3 * C, C).astype(jnp.bfloat16)

    consts = (fuse(w1), b1, fuse(w2f), b2f, fuse(w3), b3, fuse(w4f), b4f)

    # Zero-pad H: `p` rows on top (conv zero padding) and enough rows below so
    # every tile i can read H-blocks i and i+1 of size th.
    Hp = (nH + 1) * th
    x_pad = jnp.pad(x_nhwc, ((0, 0), (p, Hp - H - p), (0, 0), (0, 0)))

    in_specs = [
        pl.BlockSpec((1, th, W, C), lambda n, i: (n, i, 0, 0)),
        pl.BlockSpec((1, th, W, C), lambda n, i: (n, i + 1, 0, 0)),
    ]
    for c in consts:
        in_specs.append(
            pl.BlockSpec(c.shape, lambda n, i, _nd=c.ndim: (0,) * _nd))

    out = pl.pallas_call(
        functools.partial(_nb1d_kernel, d, th, H),
        out_shape=jax.ShapeDtypeStruct((N, nH * th, W, C), x_nhwc.dtype),
        grid_spec=pltpu.PrefetchScalarGridSpec(
            num_scalar_prefetch=0,
            grid=(N, nH),
            in_specs=in_specs,
            out_specs=pl.BlockSpec((1, th, W, C), lambda n, i: (n, i, 0, 0)),
        ),
        compiler_params=pltpu.CompilerParams(
            dimension_semantics=("parallel", "parallel")),
    )(x_pad, x_pad, *consts)

    return out if nH * th == H else out[:, :H]


def non_bottleneck_1d_pallas(x_nchw, params, dilated, *, block_h=None):
    """PyTorch-style NCHW wrapper.  Prefer the NHWC entry point end-to-end:
    these transposes cost an extra HBM round trip and only exist to match
    the nn.Module interface."""
    x = jnp.transpose(x_nchw, (0, 2, 3, 1))                       # -> NHWC
    y = non_bottleneck_1d_pallas_nhwc(x, params, dilated, block_h=block_h)
    return jnp.transpose(y, (0, 3, 1, 2))                         # -> NCHW


# -------------------------- parameter construction ------------------------- #

def init_params(key, C, eps=1e-3):
    ks = jax.random.split(key, 16)

    def conv_w(k):
        return 0.1 * jax.random.normal(k, (3, C, C), jnp.float32)

    def conv_b(k):
        return 0.1 * jax.random.normal(k, (1, C), jnp.float32)

    w1, w2, w3, w4 = (conv_w(ks[i]) for i in range(4))
    b1, b2, b3, b4 = (conv_b(ks[i]) for i in range(4, 8))

    def bn(kg, kb, km, kv):
        gamma = 1.0 + 0.1 * jax.random.normal(kg, (C,), jnp.float32)
        beta = 0.1 * jax.random.normal(kb, (C,), jnp.float32)
        mean = 0.1 * jax.random.normal(km, (C,), jnp.float32)
        var = 0.5 + jax.random.uniform(kv, (C,), jnp.float32)
        scale = gamma / jnp.sqrt(var + eps)
        shift = beta - mean * scale
        return scale.reshape(1, C), shift.reshape(1, C)

    bn1s, bn1b = bn(ks[8], ks[9], ks[10], ks[11])
    bn2s, bn2b = bn(ks[12], ks[13], ks[14], ks[15])

    return (w1, b1, w2, b2, bn1s, bn1b, w3, b3, w4, b4, bn2s, bn2b)


# ---------------------------- pure-JAX reference ---------------------------- #

def ref_forward(x_nchw, params, dil):
    w1, b1, w2, b2, s1, t1, w3, b3, w4, b4, s2, t2 = params
    x = jnp.transpose(x_nchw, (0, 2, 3, 1))   # NHWC
    dn = ("NHWC", "HWIO", "NHWC")

    def conv_h(x, w, b, d):
        k = w[:, None, :, :]                  # (3,1,Cin,Cout)
        y = lax.conv_general_dilated(x, k, (1, 1), ((d, d), (0, 0)),
                                     rhs_dilation=(d, 1), dimension_numbers=dn)
        return y + b.reshape(1, 1, 1, -1)

    def conv_w(x, w, b, d):
        k = w[None, :, :, :]                  # (1,3,Cin,Cout)
        y = lax.conv_general_dilated(x, k, (1, 1), ((0, 0), (d, d)),
                                     rhs_dilation=(1, d), dimension_numbers=dn)
        return y + b.reshape(1, 1, 1, -1)

    y = jax.nn.relu(conv_h(x, w1, b1, 1))
    y = conv_w(y, w2, b2, 1) * s1.reshape(1, 1, 1, -1) + t1.reshape(1, 1, 1, -1)
    y = jax.nn.relu(y)
    y = jax.nn.relu(conv_h(y, w3, b3, dil))
    y = conv_w(y, w4, b4, dil) * s2.reshape(1, 1, 1, -1) + t2.reshape(1, 1, 1, -1)
    y = jax.nn.relu(y + x)
    return jnp.transpose(y, (0, 3, 1, 2))


# ----------------------------------- main ----------------------------------- #

if __name__ == "__main__":
    N, C, H, W = 2, 4, 16, 16
    dilated = 2

    key = jax.random.PRNGKey(0)
    kx, kp = jax.random.split(key)
    x = jax.random.normal(kx, (N, C, H, W), jnp.float32)
    params = init_params(kp, C)

    # block_h=8 forces two H-tiles so the halo / edge-masking path is exercised.
    out = non_bottleneck_1d_pallas(x, params, dilated, block_h=8)
    out = jax.block_until_ready(out)

    ref = jax.block_until_ready(ref_forward(x, params, dilated))
    assert out.shape == (N, C, H, W)
    err = float(jnp.max(jnp.abs(out - ref)))
    # bf16 matmul operands -> relaxed tolerance vs the f32 reference.
    assert jnp.allclose(out, ref, atol=5e-2, rtol=5e-2), f"max abs err = {err}"

    print("KERNEL_OK")
</pallas_src>

<mosaic_0001>
module attributes {stable_mosaic.version = 11 : i64} {
  func.func @_nb1d_kernel(%arg0: i32, %arg1: i32, %arg2: memref<1x8x16x4xf32, #tpu.memory_space<vmem>>, %arg3: memref<1x8x16x4xf32, #tpu.memory_space<vmem>>, %arg4: memref<12x4xbf16, #tpu.memory_space<vmem>>, %arg5: memref<1x4xf32, #tpu.memory_space<vmem>>, %arg6: memref<12x4xbf16, #tpu.memory_space<vmem>>, %arg7: memref<1x4xf32, #tpu.memory_space<vmem>>, %arg8: memref<12x4xbf16, #tpu.memory_space<vmem>>, %arg9: memref<1x4xf32, #tpu.memory_space<vmem>>, %arg10: memref<12x4xbf16, #tpu.memory_space<vmem>>, %arg11: memref<1x4xf32, #tpu.memory_space<vmem>>, %arg12: memref<1x8x16x4xf32, #tpu.memory_space<vmem>>) attributes {dimension_semantics = [#tpu.dimension_semantics<parallel>, #tpu.dimension_semantics<parallel>], iteration_bounds = array<i64: 2, 2>, scalar_prefetch = 0 : i64, scratch_operands = 0 : i64, tpu.core_type = #tpu.core_type<tc>, window_params = [{transform_indices = @transform_0, window_bounds = array<i64: 1, 8, 16, 4>}, {transform_indices = @transform_1, window_bounds = array<i64: 1, 8, 16, 4>}, {pipeline_mode = #tpu.pipeline_mode<synchronous>, transform_indices = @transform_2, window_bounds = array<i64: 12, 4>}, {pipeline_mode = #tpu.pipeline_mode<synchronous>, transform_indices = @transform_3, window_bounds = array<i64: 1, 4>}, {pipeline_mode = #tpu.pipeline_mode<synchronous>, transform_indices = @transform_4, window_bounds = array<i64: 12, 4>}, {pipeline_mode = #tpu.pipeline_mode<synchronous>, transform_indices = @transform_5, window_bounds = array<i64: 1, 4>}, {pipeline_mode = #tpu.pipeline_mode<synchronous>, transform_indices = @transform_6, window_bounds = array<i64: 12, 4>}, {pipeline_mode = #tpu.pipeline_mode<synchronous>, transform_indices = @transform_7, window_bounds = array<i64: 1, 4>}, {pipeline_mode = #tpu.pipeline_mode<synchronous>, transform_indices = @transform_8, window_bounds = array<i64: 12, 4>}, {pipeline_mode = #tpu.pipeline_mode<synchronous>, transform_indices = @transform_9, window_bounds = array<i64: 1, 4>}, {transform_indices = @transform_10, window_bounds = array<i64: 1, 8, 16, 4>}]} {
    %c0 = arith.constant 0 : index
    %c0_0 = arith.constant 0 : index
    %c0_1 = arith.constant 0 : index
    %c0_2 = arith.constant 0 : index
    %0 = vector.load %arg2[%c0, %c0_0, %c0_1, %c0_2] : memref<1x8x16x4xf32, #tpu.memory_space<vmem>>, vector<1x8x16x4xf32>
    %1 = vector.shape_cast %0 : vector<1x8x16x4xf32> to vector<8x16x4xf32>
    %c0_3 = arith.constant 0 : index
    %c0_4 = arith.constant 0 : index
    %c0_5 = arith.constant 0 : index
    %c0_6 = arith.constant 0 : index
    %2 = vector.load %arg3[%c0_3, %c0_4, %c0_5, %c0_6] : memref<1x8x16x4xf32, #tpu.memory_space<vmem>>, vector<1x8x16x4xf32>
    %3 = vector.shape_cast %2 : vector<1x8x16x4xf32> to vector<8x16x4xf32>
    %4 = vector.extract_strided_slice %3 {offsets = [0, 0, 0], sizes = [6, 16, 4], strides = [1, 1, 1]} : vector<8x16x4xf32> to vector<6x16x4xf32>
    %5 = tpu.concatenate %1, %4 in 0 : vector<8x16x4xf32>, vector<6x16x4xf32> -> vector<14x16x4xf32>
    %6 = vector.extract_strided_slice %5 {offsets = [0, 0, 0], sizes = [12, 16, 4], strides = [1, 1, 1]} : vector<14x16x4xf32> to vector<12x16x4xf32>
    %7 = vector.extract_strided_slice %5 {offsets = [1, 0, 0], sizes = [12, 16, 4], strides = [1, 1, 1]} : vector<14x16x4xf32> to vector<12x16x4xf32>
    %8 = vector.extract_strided_slice %5 {offsets = [2, 0, 0], sizes = [12, 16, 4], strides = [1, 1, 1]} : vector<14x16x4xf32> to vector<12x16x4xf32>
    %9 = tpu.concatenate %6, %7, %8 in 2 : vector<12x16x4xf32>, vector<12x16x4xf32>, vector<12x16x4xf32> -> vector<12x16x12xf32>
    %10 = vector.shape_cast %9 : vector<12x16x12xf32> to vector<192x12xf32>
    %11 = arith.truncf %10 : vector<192x12xf32> to vector<192x12xbf16>
    %c0_7 = arith.constant 0 : index
    %c0_8 = arith.constant 0 : index
    %12 = vector.load %arg4[%c0_7, %c0_8] : memref<12x4xbf16, #tpu.memory_space<vmem>>, vector<12x4xbf16>
    %cst = arith.constant dense<0.000000e+00> : vector<192x4xf32>
    %13 = tpu.matmul %11, %12, %cst {dimension_numbers = #tpu.dot_dimension_numbers<[1], [0], [0], [1], [0, 0, 1, 1], [], []>} : vector<192x12xbf16>, vector<12x4xbf16>, vector<192x4xf32> -> vector<192x4xf32>
    %14 = vector.shape_cast %13 : vector<192x4xf32> to vector<12x16x4xf32>
    %c0_9 = arith.constant 0 : index
    %c0_10 = arith.constant 0 : index
    %15 = vector.load %arg5[%c0_9, %c0_10] : memref<1x4xf32, #tpu.memory_space<vmem>>, vector<1x4xf32>
    %16 = vector.shape_cast %15 : vector<1x4xf32> to vector<1x1x4xf32>
    %17 = vector.broadcast %16 : vector<1x1x4xf32> to vector<12x16x4xf32>
    %18 = arith.addf %14, %17 : vector<12x16x4xf32>
    %cst_11 = arith.constant 0.000000e+00 : f32
    %19 = vector.broadcast %cst_11 : f32 to vector<12x16x4xf32>
    %20 = arith.maximumf %18, %19 : vector<12x16x4xf32>
    %cst_12 = arith.constant 0.000000e+00 : f32
    %21 = vector.broadcast %cst_12 : f32 to vector<12x1x4xf32>
    %22 = vector.extract_strided_slice %20 {offsets = [0, 0, 0], sizes = [12, 15, 4], strides = [1, 1, 1]} : vector<12x16x4xf32> to vector<12x15x4xf32>
    %23 = tpu.concatenate %21, %22 in 1 : vector<12x1x4xf32>, vector<12x15x4xf32> -> vector<12x16x4xf32>
    %24 = vector.extract_strided_slice %20 {offsets = [0, 1, 0], sizes = [12, 15, 4], strides = [1, 1, 1]} : vector<12x16x4xf32> to vector<12x15x4xf32>
    %25 = tpu.concatenate %24, %21 in 1 : vector<12x15x4xf32>, vector<12x1x4xf32> -> vector<12x16x4xf32>
    %26 = tpu.concatenate %23, %20, %25 in 2 : vector<12x16x4xf32>, vector<12x16x4xf32>, vector<12x16x4xf32> -> vector<12x16x12xf32>
    %27 = vector.shape_cast %26 : vector<12x16x12xf32> to vector<192x12xf32>
    %28 = arith.truncf %27 : vector<192x12xf32> to vector<192x12xbf16>
    %c0_13 = arith.constant 0 : index
    %c0_14 = arith.constant 0 : index
    %29 = vector.load %arg6[%c0_13, %c0_14] : memref<12x4xbf16, #tpu.memory_space<vmem>>, vector<12x4xbf16>
    %cst_15 = arith.constant dense<0.000000e+00> : vector<192x4xf32>
    %30 = tpu.matmul %28, %29, %cst_15 {dimension_numbers = #tpu.dot_dimension_numbers<[1], [0], [0], [1], [0, 0, 1, 1], [], []>} : vector<192x12xbf16>, vector<12x4xbf16>, vector<192x4xf32> -> vector<192x4xf32>
    %31 = vector.shape_cast %30 : vector<192x4xf32> to vector<12x16x4xf32>
    %c0_16 = arith.constant 0 : index
    %c0_17 = arith.constant 0 : index
    %32 = vector.load %arg7[%c0_16, %c0_17] : memref<1x4xf32, #tpu.memory_space<vmem>>, vector<1x4xf32>
    %33 = vector.shape_cast %32 : vector<1x4xf32> to vector<1x1x4xf32>
    %34 = vector.broadcast %33 : vector<1x1x4xf32> to vector<12x16x4xf32>
    %35 = arith.addf %31, %34 : vector<12x16x4xf32>
    %cst_18 = arith.constant 0.000000e+00 : f32
    %36 = vector.broadcast %cst_18 : f32 to vector<12x16x4xf32>
    %37 = arith.maximumf %35, %36 : vector<12x16x4xf32>
    %c8_i32 = arith.constant 8 : i32
    %38 = arith.muli %arg1, %c8_i32 : i32
    %c2_i32 = arith.constant 2 : i32
    %39 = arith.subi %38, %c2_i32 : i32
    %40 = tpu.iota {dimensions = array<i32: 0>} : vector<12x16xi32>
    %41 = vector.broadcast %39 : i32 to vector<12x16xi32>
    %42 = arith.addi %41, %40 : vector<12x16xi32>
    %c0_i32 = arith.constant 0 : i32
    %43 = vector.broadcast %c0_i32 : i32 to vector<12x16xi32>
    %44 = arith.cmpi sge, %42, %43 : vector<12x16xi32>
    %c16_i32 = arith.constant 16 : i32
    %45 = vector.broadcast %c16_i32 : i32 to vector<12x16xi32>
    %46 = arith.cmpi slt, %42, %45 : vector<12x16xi32>
    %47 = arith.andi %44, %46 : vector<12x16xi1>
    %48 = arith.extui %47 : vector<12x16xi1> to vector<12x16xi32>
    %49 = arith.sitofp %48 : vector<12x16xi32> to vector<12x16xf32>
    %50 = vector.shape_cast %49 : vector<12x16xf32> to vector<12x16x1xf32>
    %51 = vector.broadcast %50 : vector<12x16x1xf32> to vector<12x16x4xf32>
    %52 = arith.mulf %37, %51 : vector<12x16x4xf32>
    %53 = vector.extract_strided_slice %52 {offsets = [0, 0, 0], sizes = [8, 16, 4], strides = [1, 1, 1]} : vector<12x16x4xf32> to vector<8x16x4xf32>
    %54 = vector.extract_strided_slice %52 {offsets = [2, 0, 0], sizes = [8, 16, 4], strides = [1, 1, 1]} : vector<12x16x4xf32> to vector<8x16x4xf32>
    %55 = vector.extract_strided_slice %52 {offsets = [4, 0, 0], sizes = [8, 16, 4], strides = [1, 1, 1]} : vector<12x16x4xf32> to vector<8x16x4xf32>
    %56 = tpu.concatenate %53, %54, %55 in 2 : vector<8x16x4xf32>, vector<8x16x4xf32>, vector<8x16x4xf32> -> vector<8x16x12xf32>
    %57 = vector.shape_cast %56 : vector<8x16x12xf32> to vector<128x12xf32>
    %58 = arith.truncf %57 : vector<128x12xf32> to vector<128x12xbf16>
    %c0_19 = arith.constant 0 : index
    %c0_20 = arith.constant 0 : index
    %59 = vector.load %arg8[%c0_19, %c0_20] : memref<12x4xbf16, #tpu.memory_space<vmem>>, vector<12x4xbf16>
    %cst_21 = arith.constant dense<0.000000e+00> : vector<128x4xf32>
    %60 = tpu.matmul %58, %59, %cst_21 {dimension_numbers = #tpu.dot_dimension_numbers<[1], [0], [0], [1], [0, 0, 1, 1], [], []>} : vector<128x12xbf16>, vector<12x4xbf16>, vector<128x4xf32> -> vector<128x4xf32>
    %61 = vector.shape_cast %60 : vector<128x4xf32> to vector<8x16x4xf32>
    %c0_22 = arith.constant 0 : index
    %c0_23 = arith.constant 0 : index
    %62 = vector.load %arg9[%c0_22, %c0_23] : memref<1x4xf32, #tpu.memory_space<vmem>>, vector<1x4xf32>
    %63 = vector.shape_cast %62 : vector<1x4xf32> to vector<1x1x4xf32>
    %64 = vector.broadcast %63 : vector<1x1x4xf32> to vector<8x16x4xf32>
    %65 = arith.addf %61, %64 : vector<8x16x4xf32>
    %cst_24 = arith.constant 0.000000e+00 : f32
    %66 = vector.broadcast %cst_24 : f32 to vector<8x16x4xf32>
    %67 = arith.maximumf %65, %66 : vector<8x16x4xf32>
    %cst_25 = arith.constant 0.000000e+00 : f32
    %68 = vector.broadcast %cst_25 : f32 to vector<8x2x4xf32>
    %69 = vector.extract_strided_slice %67 {offsets = [0, 0, 0], sizes = [8, 14, 4], strides = [1, 1, 1]} : vector<8x16x4xf32> to vector<8x14x4xf32>
    %70 = tpu.concatenate %68, %69 in 1 : vector<8x2x4xf32>, vector<8x14x4xf32> -> vector<8x16x4xf32>
    %71 = vector.extract_strided_slice %67 {offsets = [0, 2, 0], sizes = [8, 14, 4], strides = [1, 1, 1]} : vector<8x16x4xf32> to vector<8x14x4xf32>
    %72 = tpu.concatenate %71, %68 in 1 : vector<8x14x4xf32>, vector<8x2x4xf32> -> vector<8x16x4xf32>
    %73 = tpu.concatenate %70, %67, %72 in 2 : vector<8x16x4xf32>, vector<8x16x4xf32>, vector<8x16x4xf32> -> vector<8x16x12xf32>
    %74 = vector.shape_cast %73 : vector<8x16x12xf32> to vector<128x12xf32>
    %75 = arith.truncf %74 : vector<128x12xf32> to vector<128x12xbf16>
    %c0_26 = arith.constant 0 : index
    %c0_27 = arith.constant 0 : index
    %76 = vector.load %arg10[%c0_26, %c0_27] : memref<12x4xbf16, #tpu.memory_space<vmem>>, vector<12x4xbf16>
    %cst_28 = arith.constant dense<0.000000e+00> : vector<128x4xf32>
    %77 = tpu.matmul %75, %76, %cst_28 {dimension_numbers = #tpu.dot_dimension_numbers<[1], [0], [0], [1], [0, 0, 1, 1], [], []>} : vector<128x12xbf16>, vector<12x4xbf16>, vector<128x4xf32> -> vector<128x4xf32>
    %78 = vector.shape_cast %77 : vector<128x4xf32> to vector<8x16x4xf32>
    %c0_29 = arith.constant 0 : index
    %c0_30 = arith.constant 0 : index
    %79 = vector.load %arg11[%c0_29, %c0_30] : memref<1x4xf32, #tpu.memory_space<vmem>>, vector<1x4xf32>
    %80 = vector.shape_cast %79 : vector<1x4xf32> to vector<1x1x4xf32>
    %81 = vector.broadcast %80 : vector<1x1x4xf32> to vector<8x16x4xf32>
    %82 = arith.addf %78, %81 : vector<8x16x4xf32>
    %83 = vector.extract_strided_slice %5 {offsets = [3, 0, 0], sizes = [8, 16, 4], strides = [1, 1, 1]} : vector<14x16x4xf32> to vector<8x16x4xf32>
    %84 = arith.addf %82, %83 : vector<8x16x4xf32>
    %cst_31 = arith.constant 0.000000e+00 : f32
    %85 = vector.broadcast %cst_31 : f32 to vector<8x16x4xf32>
    %86 = arith.maximumf %84, %85 : vector<8x16x4xf32>
    %c0_32 = arith.constant 0 : index
    %c0_33 = arith.constant 0 : index
    %c0_34 = arith.constant 0 : index
    %c0_35 = arith.constant 0 : index
    %87 = vector.load %arg12[%c0_32, %c0_33, %c0_34, %c0_35] : memref<1x8x16x4xf32, #tpu.memory_space<vmem>>, vector<1x8x16x4xf32>
    %88 = vector.shape_cast %87 : vector<1x8x16x4xf32> to vector<8x16x4xf32>
    %89 = vector.shape_cast %86 : vector<8x16x4xf32> to vector<1x8x16x4xf32>
    tpu.vector_store %arg12[%c0_32, %c0_33, %c0_34, %c0_35], %89 {strides = array<i32>} : memref<1x8x16x4xf32, #tpu.memory_space<vmem>>, vector<1x8x16x4xf32>,
    return
  }
  func.func @transform_0(%arg0: i32, %arg1: i32) -> (i32, i32, i32, i32) {
    %c0_i32 = arith.constant 0 : i32
    %c0_i32_0 = arith.constant 0 : i32
    %c0_i32_1 = arith.constant 0 : i32
    return %arg0, %arg1, %c0_i32, %c0_i32_0 : i32, i32, i32, i32
  }
  func.func @transform_1(%arg0: i32, %arg1: i32) -> (i32, i32, i32, i32) {
    %c1_i32 = arith.constant 1 : i32
    %0 = arith.addi %arg1, %c1_i32 : i32
    %c0_i32 = arith.constant 0 : i32
    %c0_i32_0 = arith.constant 0 : i32
    %c0_i32_1 = arith.constant 0 : i32
    return %arg0, %0, %c0_i32, %c0_i32_0 : i32, i32, i32, i32
  }
  func.func @transform_2(%arg0: i32, %arg1: i32) -> (i32, i32) {
    %c0_i32 = arith.constant 0 : i32
    %c0_i32_0 = arith.constant 0 : i32
    %c0_i32_1 = arith.constant 0 : i32
    return %c0_i32, %c0_i32_0 : i32, i32
  }
  func.func @transform_3(%arg0: i32, %arg1: i32) -> (i32, i32) {
    %c0_i32 = arith.constant 0 : i32
    %c0_i32_0 = arith.constant 0 : i32
    %c0_i32_1 = arith.constant 0 : i32
    return %c0_i32, %c0_i32_0 : i32, i32
  }
  func.func @transform_4(%arg0: i32, %arg1: i32) -> (i32, i32) {
    %c0_i32 = arith.constant 0 : i32
    %c0_i32_0 = arith.constant 0 : i32
    %c0_i32_1 = arith.constant 0 : i32
    return %c0_i32, %c0_i32_0 : i32, i32
  }
  func.func @transform_5(%arg0: i32, %arg1: i32) -> (i32, i32) {
    %c0_i32 = arith.constant 0 : i32
    %c0_i32_0 = arith.constant 0 : i32
    %c0_i32_1 = arith.constant 0 : i32
    return %c0_i32, %c0_i32_0 : i32, i32
  }
  func.func @transform_6(%arg0: i32, %arg1: i32) -> (i32, i32) {
    %c0_i32 = arith.constant 0 : i32
    %c0_i32_0 = arith.constant 0 : i32
    %c0_i32_1 = arith.constant 0 : i32
    return %c0_i32, %c0_i32_0 : i32, i32
  }
  func.func @transform_7(%arg0: i32, %arg1: i32) -> (i32, i32) {
    %c0_i32 = arith.constant 0 : i32
    %c0_i32_0 = arith.constant 0 : i32
    %c0_i32_1 = arith.constant 0 : i32
    return %c0_i32, %c0_i32_0 : i32, i32
  }
  func.func @transform_8(%arg0: i32, %arg1: i32) -> (i32, i32) {
    %c0_i32 = arith.constant 0 : i32
    %c0_i32_0 = arith.constant 0 : i32
    %c0_i32_1 = arith.constant 0 : i32
    return %c0_i32, %c0_i32_0 : i32, i32
  }
  func.func @transform_9(%arg0: i32, %arg1: i32) -> (i32, i32) {
    %c0_i32 = arith.constant 0 : i32
    %c0_i32_0 = arith.constant 0 : i32
    %c0_i32_1 = arith.constant 0 : i32
    return %c0_i32, %c0_i32_0 : i32, i32
  }
  func.func @transform_10(%arg0: i32, %arg1: i32) -> (i32, i32, i32, i32) {
    %c0_i32 = arith.constant 0 : i32
    %c0_i32_0 = arith.constant 0 : i32
    %c0_i32_1 = arith.constant 0 : i32
    return %arg0, %arg1, %c0_i32, %c0_i32_0 : i32, i32, i32, i32
  }
}

</mosaic_0001>

<bundles_post_ra>
// kernel: tpu_custom_call.1
= control target key start
LH: loop header
LB: loop body
LE: loop exit
PB: predicated region body
PF: predicated region fallthrough
CT: control target
= control target key end

     0   :  { %s2917_s13 = smov 0   ;;  %s2919_s14 = smov 0   ;;  %s3979_s0 = inlined_call_operand.vmem [shape: f32[2,24,16,4], index: 0, kind: input, shape index: {}]   ;;  %s3980_s1 = inlined_call_operand.vmem [shape: f32[2,24,16,4], index: 1, kind: input, shape index: {}]   ;;  %s3981_s2 = inlined_call_operand.vmem [shape: bf16[12,4], index: 2, kind: input, shape index: {}]   ;;  %s3982_s3 = inlined_call_operand.vmem [shape: f32[1,4], index: 3, kind: input, shape index: {}]   ;;  %s3983_s4 = inlined_call_operand.vmem [shape: bf16[12,4], index: 4, kind: input, shape index: {}]   ;;  %s3984_s5 = inlined_call_operand.vmem [shape: f32[1,4], index: 5, kind: input, shape index: {}]   ;;  %s3985_s6 = inlined_call_operand.vmem [shape: bf16[12,4], index: 6, kind: input, shape index: {}]   ;;  %s3986_s7 = inlined_call_operand.vmem [shape: f32[1,4], index: 7, kind: input, shape index: {}]   ;;  %s3987_s8 = inlined_call_operand.vmem [shape: bf16[12,4], index: 8, kind: input, shape index: {}]   ;;  %s3988_s9 = inlined_call_operand.vmem [shape: f32[1,4], index: 9, kind: input, shape index: {}]   ;;  %s3989_s10 = inlined_call_operand.vmem [shape: f32[2,16,16,4], index: 10, kind: output, shape index: {}]  }
   0x1   :  { %s2921_s15 = smov 0   ;;  %s2923_s16 = smov 0  }
   0x2   :  { %s2925_s17 = smov 0  }
   0x3 LB: > { %s29_s18 = sadd.s32 1, %s2849_s15  ;;  %s32_s19 = sadd.s32 1, %s2853_s16  ;;  %s2857_s17 = sphi %s2925_s17, %s20_s17   ;;  %s2853_s16 = sphi %s2923_s16, %s3993_s16   ;;  %s2849_s15 = sphi %s2921_s15, %s3992_s15   ;;  %s2845_s14 = sphi %s2919_s14, %s3991_s14   ;;  %s2841_s13 = sphi %s2917_s13, %s3990_s13  }
   0x4   : > { %p30_p0 = scmp.ge.s32.totalorder %s29_s18, 2  ;;  %p2274_p1 = scmp.ge.s32.totalorder %s2857_s17, 1 }
   0x5   : > { %p356_p2 = scmp.lt.s32.totalorder %s2857_s17, 5 }
   0x6   : > { %s3995_s18 = smov (%p30_p0, %s29_s18), 0  ;;  %s3997_s19 = smov (!%p30_p0, %s32_s19), %s2853_s16 }
   0x7   : > { %p357_p3 = pnand %p2274_p1, %p356_p2  ;;  %p34_p4 = scmp.ge.s32.totalorder %s3997_s19, 2 }
   0x8   : > { %s2947_s20 = sshll.u32 (!%p357_p3), %s2841_s13, 3  ;;  %p416_p5 = scmp.lt.s32.totalorder (!%p357_p3), %s2845_s14, 1 }
   0x9   : > { %s3999_s19 = smov (%p34_p4, %s3997_s19), 0  ;;  %360 = sbr.rel (%p357_p3) target bundleno = 1269 (0x4f5), region = 60 }
   0xa   : > { %p418_p6 = scmp.lt.s32.totalorder (!%p357_p3), %s2947_s20, 23  ;;  %s2859_s29 = smov (!%p357_p3), 4  }
   0xb   : > { %s2348_s30 = sadd.s32 (!%p357_p3), 8, %s2947_s20  ;;  %s2860_s11 = smov (!%p357_p3), 8  }
   0xc   : > { %p430_p7 = scmp.lt.s32.totalorder (!%p357_p3), %s2348_s30, 23  ;;  %s2318_s26 = sadd.s32 (!%p357_p3), 4294967294, %s2947_s20 }
   0xd   : > { %p442_p8 = scmp.lt.s32.totalorder (!%p357_p3), %s2947_s20, 15 }
   0xe   : > { %s4001_s14 = smov (!%p416_p5, %s2845_s14), 1  ;;  %s4003_s30 = smov (!%p430_p7, %s2348_s30), 23  ;;  %v2287_v27 = vld [vmem:[%s3981_s2] sm:$0xf]  ;;  %v2349_v28 = vld [vmem:[%s3981_s2] sm:$0x30] }
   0xf   : > { %s419_s21 = scalar_select %p418_p6, %s2947_s20, 23  ;;  %v2288_v29 = vor.u32 %v2349_v28, %v2287_v27  ;;  %vm755_vm0 = vcmask 1045504   ;;  %vm649_vm1 = vcmask 31744   ;;  %vm674_vm2 = vcmask 64512  }
  0x10   : > { %s2355_s22 = smul.u32 48, %s4001_s14  ;;  %s2279_s12 = sshll.u32 %s4003_s30, 1  ;;  %vm718_vm3 = vcmask 97280   ;;  %vm977_vm4 = vcmask 1046528   ;;  %vm904_vm5 = vcmask 1040384   ;;  %vm1766_vm12 = vcmask 1041408  }
  0x11   : > { %s2276_s23 = sshll.u32 %s419_s21, 1  ;;  %v757_v30 = vsel %vm755_vm0, %v2288_v29, 0  ;;  %s4005_s20 = smov (!%p442_p8, %s2947_s20), 15 }
  0x12   : > { %s422_s24 = sadd.s32 %s2355_s22, %s2276_s23  ;;  %s434_s13 = sadd.s32 %s2355_s22, %s2279_s12  ;;  %766 = vmatpush.bf16.msra.mxu0 %v757_v30  ;;  %2353 = vmatpush.bf16.msra.mxu2 %v757_v30 }
  0x13   : > { %s2277_s25 = sshll.u32 %s422_s24, 3  ;;  %s2280_s21 = sshll.u32 %s434_s13, 3 }
  0x14   : > { %s2959_s28 = scalar_lea.vmem %s3979_s0, %s2277_s25  ;;  %s3032_s25 = scalar_lea.vmem %s3980_s1, %s2280_s21 }
  0x15   : > { %v2962_v0 = vld [vmem:[%s2959_s28 + $0x10] sm:$0xff]  ;;  %v2965_v1 = vld [vmem:[%s2959_s28 + $0x18] sm:$0xff]  ;;  %v2968_v2 = vld [vmem:[%s2959_s28 + $0x20] sm:$0xff] }
  0x16   : > { %v2399_v3 = vpack.i.bf16 %v2965_v1, %v2962_v0  ;;  %v2973_v4 = vld [vmem:[%s2959_s28 + $0x28] sm:$0xff]  ;;  %v2976_v5 = vld [vmem:[%s2959_s28 + $0x30] sm:$0xff]  ;;  %v2979_v6 = vld [vmem:[%s2959_s28 + $0x38] sm:$0xff] }
  0x17   : > { %v2409_v7 = vpack.i.bf16 %v2973_v4, %v2968_v2  ;;  %v2419_v8 = vpack.i.bf16 %v2979_v6, %v2976_v5  ;;  %v2990_v9 = vld [vmem:[%s2959_s28 + $0x40] sm:$0xff]  ;;  %v2993_v10 = vld [vmem:[%s2959_s28 + $0x48] sm:$0xff]  ;;  %v3001_v12 = vld [vmem:[%s2959_s28 + $0x50] sm:$0xff] }
  0x18   : > { %2400 = vrot.lane.b32.xlu0 %v2399_v3, %s2859_s29  ;;  %v2424_v11 = vpack.i.bf16 %v2993_v10, %v2990_v9  ;;  %v3004_v13 = vld [vmem:[%s2959_s28 + $0x58] sm:$0xff]  ;;  %v3011_v15 = vld [vmem:[%s2959_s28 + $0x60] sm:$0xff]  ;;  %v3014_v16 = vld [vmem:[%s2959_s28 + $0x68] sm:$0xff] }
  0x19   : > { %2410 = vrot.lane.b32.xlu1 %v2409_v7, %s2859_s29  ;;  %2420 = vrot.lane.b32.xlu2 %v2419_v8, %s2859_s29  ;;  %v2434_v14 = vpack.i.bf16 %v3004_v13, %v3001_v12  ;;  %v2444_v17 = vpack.i.bf16 %v3014_v16, %v3011_v15  ;;  %v3022_v18 = vld [vmem:[%s2959_s28 + $0x70] sm:$0xff]  ;;  %v3025_v19 = vld [vmem:[%s2959_s28 + $0x78] sm:$0xff] }
  0x1a   : > { %v2454_v20 = vpack.i.bf16 %v3025_v19, %v3022_v18  ;;  %v3038_v21 = vld [vmem:[%s3032_s25] sm:$0xff]  ;;  %v3041_v22 = vld [vmem:[%s3032_s25 + $0x8] sm:$0xff]  ;;  %v3048_v24 = vld [vmem:[%s3032_s25 + $0x10] sm:$0xff] }
  0x1b   : > { %v2464_v23 = vpack.i.bf16 %v3041_v22, %v3038_v21  ;;  %v3051_v25 = vld [vmem:[%s3032_s25 + $0x18] sm:$0xff]  ;;  %v3064_v31 = vld [vmem:[%s3032_s25 + $0x20] sm:$0xff]  ;;  %v3067_v32 = vld [vmem:[%s3032_s25 + $0x28] sm:$0xff] }
  0x1c   : > { %v2474_v26 = vpack.i.bf16 %v3051_v25, %v3048_v24  ;;  %v2489_v33 = vpack.i.bf16 %v3067_v32, %v3064_v31  ;;  %v475_v34 = vld [vmem:[%s3032_s25 + $0x40] sm:$0xff]  ;;  %v476_v35 = vld [vmem:[%s3032_s25 + $0x48] sm:$0xff]  ;;  %v3078_v37 = vld [vmem:[%s3032_s25 + $0x30] sm:$0xff] }
  0x1d   : > { %v2504_v36 = vpack.i.bf16 %v476_v35, %v475_v34  ;;  %v3081_v38 = vld [vmem:[%s3032_s25 + $0x38] sm:$0xff]  ;;  %v451_v43 = vld [vmem:[%s2959_s28] sm:$0xff]  ;;  %v452_v44 = vld [vmem:[%s2959_s28 + $0x8] sm:$0xff] }
  0x1e   : > { %v2494_v39 = vpack.i.bf16 %v3081_v38, %v3078_v37 }
  0x20   : > { %2405 = vrot.lane.b32.xlu0 %v2409_v7, %s2860_s11  ;;  %v477_v7 = vld [vmem:[%s3032_s25 + $0x50] sm:$0xff] }
  0x21   : > { %2415 = vrot.lane.b32.xlu1 %v2419_v8, %s2860_s11  ;;  %2425 = vrot.lane.b32.xlu2 %v2424_v11, %s2860_s11  ;;  %v478_v8 = vld [vmem:[%s3032_s25 + $0x58] sm:$0xff] }
  0x28   : > { %2430 = vrot.lane.b32.xlu0 %v2424_v11, %s2859_s29  ;;  %v2514_v11 = vpack.i.bf16 %v478_v8, %v477_v7 }
  0x29   : > { %2435 = vrot.lane.b32.xlu1 %v2434_v14, %s2860_s11  ;;  %2440 = vrot.lane.b32.xlu2 %v2434_v14, %s2859_s29 }
  0x30   : > { %2445 = vrot.lane.b32.xlu0 %v2444_v17, %s2860_s11 }
  0x31   : > { %2450 = vrot.lane.b32.xlu1 %v2444_v17, %s2859_s29  ;;  %2455 = vrot.lane.b32.xlu2 %v2454_v20, %s2860_s11 }
  0x38   : > { %2460 = vrot.lane.b32.xlu0 %v2454_v20, %s2859_s29 }
  0x39   : > { %2465 = vrot.lane.b32.xlu1 %v2464_v23, %s2860_s11  ;;  %2470 = vrot.lane.b32.xlu2 %v2464_v23, %s2859_s29 }
  0x40   : > { %2475 = vrot.lane.b32.xlu0 %v2474_v26, %s2860_s11 }
  0x41   : > { %2480 = vrot.lane.b32.xlu1 %v2474_v26, %s2859_s29  ;;  %2485 = vrot.lane.b32.xlu2 %v2489_v33, %s2860_s11 }
  0x48   : > { %2490 = vrot.lane.b32.xlu0 %v2489_v33, %s2859_s29 }
  0x49   : > { %2495 = vrot.lane.b32.xlu1 %v2494_v39, %s2860_s11  ;;  %2500 = vrot.lane.b32.xlu2 %v2494_v39, %s2859_s29 }
  0x50   : > { %2505 = vrot.lane.b32.xlu0 %v2504_v36, %s2860_s11 }
  0x51   : > { %2510 = vrot.lane.b32.xlu1 %v2504_v36, %s2859_s29  ;;  %2515 = vrot.lane.b32.xlu2 %v2514_v11, %s2860_s11 }
  0x73   : > { %v2421_v61 = vpop.permute.xlu2 %2420 }
  0x74   : > { %v2423_v14 = vunpack.i.h.bf16 %v2421_v61  ;;  %v2422_v17 = vunpack.i.l.bf16 %v2421_v61 }
  0x76   : > { %v655_v26 = vsel %vm649_vm1, %v2973_v4, %v2423_v14 }
  0x7b   : > { %v2426_v20 = vpop.permute.xlu2 %2425 }
  0x7c   : > { %v2427_v23 = vunpack.i.l.bf16 %v2426_v20 }
  0x8a   : > { %v2401_v40 = vpop.permute.xlu0 %2400 }
  0x8b   : > { %v2403_v41 = vunpack.i.h.bf16 %v2401_v40  ;;  %v2402_v42 = vunpack.i.l.bf16 %v2401_v40  ;;  %v2411_v46 = vpop.permute.xlu1 %2410 }
  0x8c   : > { %v2413_v54 = vunpack.i.h.bf16 %v2411_v46  ;;  %v2412_v55 = vunpack.i.l.bf16 %v2411_v46 }
  0x8d   : > { %v650_v49 = vsel %vm649_vm1, %v451_v43, %v2402_v42  ;;  %v651_v50 = vsel %vm649_vm1, %v452_v44, %v2403_v41  ;;  %v2441_v43 = vpop.permute.xlu2 %2440 }
  0x8e   : > { %v652_v59 = vsel %vm649_vm1, %v2962_v0, %v2412_v55  ;;  %v653_v60 = vsel %vm649_vm1, %v2965_v1, %v2413_v54  ;;  %v2428_v0 = vunpack.i.h.bf16 %v2426_v20  ;;  %v654_v1 = vsel %vm649_vm1, %v2968_v2, %v2422_v17 }
  0x8f   : > { %v679_v27 = vsel %vm674_vm2, %v654_v1, %v2427_v23  ;;  %v2443_v44 = vunpack.i.h.bf16 %v2441_v43 }
  0x90   : > { %v680_v28 = vsel %vm674_vm2, %v655_v26, %v2428_v0 }
  0x91   : > { %v701_v29 = vpack.c.bf16 %v680_v28, %v679_v27 }
  0x92   : > { %v2406_v45 = vpop.permute.xlu0 %2405 }
  0x93   : > { %v2408_v47 = vunpack.i.h.bf16 %v2406_v45  ;;  %v2407_v48 = vunpack.i.l.bf16 %v2406_v45  ;;  %v2416_v56 = vpop.permute.xlu1 %2415  ;;  %v2442_v45 = vunpack.i.l.bf16 %v2441_v43 }
  0x94   : > { %v2418_v57 = vunpack.i.h.bf16 %v2416_v56  ;;  %v2417_v58 = vunpack.i.l.bf16 %v2416_v56 }
  0x95   : > { %v675_v51 = vsel %vm674_vm2, %v650_v49, %v2407_v48  ;;  %v676_v52 = vsel %vm674_vm2, %v651_v50, %v2408_v47  ;;  %v659_v49 = vsel %vm649_vm1, %v2993_v10, %v2443_v44  ;;  %v2456_v55 = vpop.permute.xlu2 %2455 }
  0x96   : > { %v699_v53 = vpack.c.bf16 %v676_v52, %v675_v51  ;;  %v677_v62 = vsel %vm674_vm2, %v652_v59, %v2417_v58  ;;  %v678_v63 = vsel %vm674_vm2, %v653_v60, %v2418_v57  ;;  %v2458_v56 = vunpack.i.h.bf16 %v2456_v55 }
  0x97   : > { %v700_v3 = vpack.c.bf16 %v678_v63, %v677_v62  ;;  %v2457_v57 = vunpack.i.l.bf16 %v2456_v55 }
  0x98   : > { %2289 = vmatmul.msk.bf16.vlgmr.msra.gmra.mxu0 %vm718_vm3, %v699_v53 }
  0x9a   : > { %v2431_v30 = vpop.permute.xlu0 %2430 }
  0x9b   : > { %v2433_v33 = vunpack.i.h.bf16 %v2431_v30  ;;  %v2432_v34 = vunpack.i.l.bf16 %v2431_v30  ;;  %v2436_v35 = vpop.permute.xlu1 %2435 }
  0x9c   : > { %v2438_v36 = vunpack.i.h.bf16 %v2436_v35  ;;  %v2437_v39 = vunpack.i.l.bf16 %v2436_v35 }
  0x9d   : > { %v657_v40 = vsel %vm649_vm1, %v2979_v6, %v2433_v33  ;;  %v656_v2 = vsel %vm649_vm1, %v2976_v5, %v2432_v34  ;;  %v658_v6 = vsel %vm649_vm1, %v2990_v9, %v2442_v45  ;;  %v2471_v62 = vpop.permute.xlu2 %2470 }
  0x9e   : > { %v681_v4 = vsel %vm674_vm2, %v656_v2, %v2437_v39  ;;  %v682_v41 = vsel %vm674_vm2, %v657_v40, %v2438_v36  ;;  %v2473_v35 = vunpack.i.h.bf16 %v2471_v62  ;;  %v2472_v36 = vunpack.i.l.bf16 %v2471_v62 }
  0x9f   : > { %v702_v42 = vpack.c.bf16 %v682_v41, %v681_v4 }
  0xa2   : > { %v2446_v46 = vpop.permute.xlu0 %2445 }
  0xa3   : > { %v2448_v47 = vunpack.i.h.bf16 %v2446_v46  ;;  %v2447_v48 = vunpack.i.l.bf16 %v2446_v46  ;;  %v2451_v52 = vpop.permute.xlu1 %2450 }
  0xa4   : > { %v2453_v53 = vunpack.i.h.bf16 %v2451_v52  ;;  %v2452_v54 = vunpack.i.l.bf16 %v2451_v52 }
  0xa5   : > { %v683_v5 = vsel %vm674_vm2, %v658_v6, %v2447_v48  ;;  %v684_v50 = vsel %vm674_vm2, %v659_v49, %v2448_v47  ;;  %v2486_v11 = vpop.permute.xlu2 %2485 }
  0xa6   : > { %v703_v51 = vpack.c.bf16 %v684_v50, %v683_v5  ;;  %v661_v10 = vsel %vm649_vm1, %v3004_v13, %v2453_v53  ;;  %v660_v9 = vsel %vm649_vm1, %v3001_v12, %v2452_v54  ;;  %v2488_v55 = vunpack.i.h.bf16 %v2486_v11 }
  0xa7   : > { %v685_v59 = vsel %vm674_vm2, %v660_v9, %v2457_v57  ;;  %v686_v60 = vsel %vm674_vm2, %v661_v10, %v2458_v56  ;;  %v2487_v56 = vunpack.i.l.bf16 %v2486_v11 }
  0xa8   : > { %2290 = vmatmul.msk.bf16.gmra.mxu0 %vm718_vm3, %v700_v3  ;;  %v704_v61 = vpack.c.bf16 %v686_v60, %v685_v59  ;;  %v3173_v59 = vld [vmem:[%s3982_s3] ss:$0 sm:$0xff] }
  0xaa   : > { %v2461_v58 = vpop.permute.xlu0 %2460 }
  0xab   : > { %v2463_v3 = vunpack.i.h.bf16 %v2461_v58  ;;  %v2462_v7 = vunpack.i.l.bf16 %v2461_v58  ;;  %v2466_v8 = vpop.permute.xlu1 %2465 }
  0xac   : > { %v2468_v14 = vunpack.i.h.bf16 %v2466_v8  ;;  %v2467_v17 = vunpack.i.l.bf16 %v2466_v8 }
  0xad   : > { %v663_v12 = vsel %vm649_vm1, %v3014_v16, %v2463_v3  ;;  %v662_v13 = vsel %vm649_vm1, %v3011_v15, %v2462_v7  ;;  %v2501_v27 = vpop.permute.xlu2 %2500 }
  0xae   : > { %v687_v0 = vsel %vm674_vm2, %v662_v13, %v2467_v17  ;;  %v688_v23 = vsel %vm674_vm2, %v663_v12, %v2468_v14  ;;  %v2503_v28 = vunpack.i.h.bf16 %v2501_v27 }
  0xaf   : > { %v705_v1 = vpack.c.bf16 %v688_v23, %v687_v0 }
  0xb0   : > { %v671_v16 = vsel %vm649_vm1, %v3067_v32, %v2503_v28  ;;  %v664_v32 = vsel %vm649_vm1, %v3022_v18, %v2472_v36 }
  0xb2   : > { %v2476_v63 = vpop.permute.xlu0 %2475 }
  0xb3   : > { %v2481_v26 = vpop.permute.xlu1 %2480  ;;  %v2478_v4 = vunpack.i.h.bf16 %v2476_v63  ;;  %v2477_v41 = vunpack.i.l.bf16 %v2476_v63 }
  0xb4   : > { %v2483_v50 = vunpack.i.h.bf16 %v2481_v26 }
  0xb5   : > { %v2516_v49 = vpop.permute.xlu2 %2515 }
  0xb6   : > { %v2518_v6 = vunpack.i.h.bf16 %v2516_v49  ;;  %v2517_v5 = vunpack.i.l.bf16 %v2516_v49  ;;  %v667_v57 = vsel %vm649_vm1, %v3041_v22, %v2483_v50 }
  0xb8   : > { %2291 = vmatmul.msk.bf16.gmra.mxu0 %vm718_vm3, %v701_v29  ;;  %v2502_v29 = vunpack.i.l.bf16 %v2501_v27 }
  0xba   : > { %v3134_v20 = vpop.permute.xlu0 %2490  ;;  %v670_v15 = vsel %vm649_vm1, %v3064_v31, %v2502_v29  ;;  %v689_v31 = vsel %vm674_vm2, %v664_v32, %v2477_v41 }
  0xbb   : > { %v2496_v43 = vpop.permute.xlu1 %2495  ;;  %v2493_v22 = vunpack.i.h.bf16 %v3134_v20 }
  0xbc   : > { %v2498_v3 = vunpack.i.h.bf16 %v2496_v43  ;;  %v2497_v7 = vunpack.i.l.bf16 %v2496_v43 }
  0xbd   : > { %v669_v8 = vsel %vm649_vm1, %v3051_v25, %v2493_v22 }
  0xc2   : > { %v2506_v30 = vpop.permute.xlu0 %2505 }
  0xc3   : > { %v2508_v33 = vunpack.i.h.bf16 %v2506_v30  ;;  %v2507_v34 = vunpack.i.l.bf16 %v2506_v30  ;;  %v2511_v46 = vpop.permute.xlu1 %2510 }
  0xc4   : > { %v2513_v47 = vunpack.i.h.bf16 %v2511_v46  ;;  %v2512_v48 = vunpack.i.l.bf16 %v2511_v46 }
  0xc5   : > { %v695_v39 = vsel %vm674_vm2, %v670_v15, %v2507_v34  ;;  %v696_v40 = vsel %vm674_vm2, %v671_v16, %v2508_v33 }
  0xc6   : > { %v709_v2 = vpack.c.bf16 %v696_v40, %v695_v39  ;;  %v672_v18 = vsel %vm649_vm1, %v3078_v37, %v2512_v48  ;;  %v692_v37 = vsel %vm674_vm2, %v667_v57, %v2488_v55 }
  0xc7   : > { %v697_v52 = vsel %vm674_vm2, %v672_v18, %v2517_v5 }
  0xc8   : > { %2292 = vmatmul.msk.bf16.gmra.mxu0 %vm718_vm3, %v702_v42  ;;  %2299 = vmatmul.msk.bf16.vlgmr.msra.gmra.mxu2 %vm718_vm3, %v709_v2  ;;  %v665_v42 = vsel %vm649_vm1, %v3025_v19, %v2473_v35  ;;  %v673_v19 = vsel %vm649_vm1, %v3081_v38, %v2513_v47 }
  0xc9   : > { %v690_v44 = vsel %vm674_vm2, %v665_v42, %v2478_v4  ;;  %v698_v53 = vsel %vm674_vm2, %v673_v19, %v2518_v6 }
  0xca   : > { %v706_v45 = vpack.c.bf16 %v690_v44, %v689_v31  ;;  %v710_v54 = vpack.c.bf16 %v698_v53, %v697_v52 }
  0xd8   : > { %2293 = vmatmul.msk.bf16.gmra.mxu0 %vm718_vm3, %v703_v51  ;;  %v2482_v51 = vunpack.i.l.bf16 %v2481_v26  ;;  %2300 = vmatmul.msk.bf16.gmra.mxu2 %vm718_vm3, %v710_v54 }
  0xda   : > { %v666_v38 = vsel %vm649_vm1, %v3038_v21, %v2482_v51 }
  0xdb   : > { %v691_v58 = vsel %vm674_vm2, %v666_v38, %v2487_v56 }
  0xdc   : > { %v707_v10 = vpack.c.bf16 %v692_v37, %v691_v58 }
  0xe8   : > { %2294 = vmatmul.msk.bf16.gmra.mxu0 %vm718_vm3, %v704_v61  ;;  %v2492_v61 = vunpack.i.l.bf16 %v3134_v20 }
  0xea   : > { %v668_v11 = vsel %vm649_vm1, %v3048_v24, %v2492_v61 }
  0xeb   : > { %v693_v23 = vsel %vm674_vm2, %v668_v11, %v2497_v7 }
  0xf8   : > { %2295 = vmatmul.msk.bf16.gmra.mxu0 %vm718_vm3, %v705_v1  ;;  %v694_v1 = vsel %vm674_vm2, %v669_v8, %v2498_v3 }
  0xf9   : > { %v708_v29 = vpack.c.bf16 %v694_v1, %v693_v23 }
 0x108   : > { %2296 = vmatmul.msk.bf16.gmra.mxu0 %vm718_vm3, %v706_v45 }
 0x115   : > { %v768_v9 = vpop.f32.mrf.mxu0 }
 0x116   : > { %v832_v60 = vadd.f32 %v3173_v59, %v768_v9 }
 0x118   : > { %2297 = vmatmul.msk.bf16.gmra.mxu0 %vm718_vm3, %v707_v10  ;;  %v3179_v21 = vmax.f32 %v832_v60, 0.0 }
 0x11a   : > { %v905_v17 = vrot.slane %v3179_v21, 7  ;;  %v978_v12 = vrot.slane %v3179_v21, 1 }
 0x11d   : > { %v770_v62 = vpop.f32.mrf.mxu0 }
 0x11e   : > { %v833_v63 = vadd.f32 %v3173_v59, %v770_v62 }
 0x120   : > { %v857_v14 = vmax.f32 %v833_v63, 0.0 }
 0x122   : > { %v906_v20 = vrot.slane %v857_v14, 7  ;;  %v979_v13 = vrot.slane %v857_v14, 1  ;;  %v2519_v0 = vpack.i.bf16 %v857_v14, %v3179_v21 }
 0x124   : > { %2520 = vrot.lane.b32.xlu0 %v2519_v0, %s2859_s29  ;;  %v980_v25 = vsel %vm977_vm4, %v978_v12, %v979_v13  ;;  %v1026_v24 = vsel %vm977_vm4, %v979_v13, 0.0  ;;  %v3197_v26 = vsel %vm904_vm5, %v905_v17, %v906_v20 }
 0x125   : > { %v773_v27 = vpop.f32.mrf.mxu0  ;;  %v2524_v28 = vpack.i.bf16 %v1026_v24, %v980_v25 }
 0x126   : > { %v834_v30 = vadd.f32 %v3173_v59, %v773_v27 }
 0x127   : > { %2525 = vrot.lane.b32.xlu1 %v2524_v28, %s2860_s11 }
 0x128   : > { %2298 = vmatmul.msk.bf16.gmra.mxu0 %vm718_vm3, %v708_v29  ;;  %v3202_v33 = vmax.f32 %v834_v30, 0.0 }
 0x12a   : > { %v908_v35 = vrot.slane %v3202_v33, 7  ;;  %v981_v36 = vrot.slane %v3202_v33, 1 }
 0x12d   : > { %v775_v34 = vpop.f32.mrf.mxu0 }
 0x12e   : > { %v835_v16 = vadd.f32 %v3173_v59, %v775_v34 }
 0x130   : > { %v859_v15 = vmax.f32 %v835_v16, 0.0 }
 0x132   : > { %v909_v39 = vrot.slane %v859_v15, 7  ;;  %v982_v40 = vrot.slane %v859_v15, 1  ;;  %v2529_v2 = vpack.i.bf16 %v859_v15, %v3202_v33 }
 0x134   : > { %2530 = vrot.lane.b32.xlu2 %v2529_v2, %s2859_s29  ;;  %v983_v4 = vsel %vm977_vm4, %v981_v36, %v982_v40  ;;  %v1027_v41 = vsel %vm977_vm4, %v982_v40, 0.0  ;;  %v3214_v42 = vsel %vm904_vm5, %v908_v35, %v909_v39 }
 0x135   : > { %v778_v32 = vpop.f32.mrf.mxu0  ;;  %v2534_v43 = vpack.i.bf16 %v1027_v41, %v983_v4 }
 0x136   : > { %v836_v31 = vadd.f32 %v3173_v59, %v778_v32 }
 0x137   : > { %2535 = vrot.lane.b32.xlu0 %v2534_v43, %s2860_s11 }
 0x138   : > { %v3218_v44 = vmax.f32 %v836_v31, 0.0 }
 0x13a   : > { %v911_v48 = vrot.slane %v3218_v44, 7  ;;  %v984_v49 = vrot.slane %v3218_v44, 1 }
 0x13d   : > { %v780_v45 = vpop.f32.mrf.mxu0 }
 0x13e   : > { %v837_v46 = vadd.f32 %v3173_v59, %v780_v45 }
 0x140   : > { %v861_v47 = vmax.f32 %v837_v46, 0.0 }
 0x142   : > { %v912_v6 = vrot.slane %v861_v47, 7  ;;  %v985_v5 = vrot.slane %v861_v47, 1  ;;  %v2539_v19 = vpack.i.bf16 %v861_v47, %v3218_v44  ;;  %v2303_v47 = vld [vmem:[%s3983_s4] sm:$0xf] }
 0x144   : > { %2540 = vrot.lane.b32.xlu1 %v2539_v19, %s2859_s29  ;;  %v986_v18 = vsel %vm977_vm4, %v984_v49, %v985_v5  ;;  %v1028_v50 = vsel %vm977_vm4, %v985_v5, 0.0  ;;  %v3230_v51 = vsel %vm904_vm5, %v911_v48, %v912_v6  ;;  %v2350_v49 = vld [vmem:[%s3983_s4] sm:$0x30] }
 0x145   : > { %v783_v52 = vpop.f32.mrf.mxu0  ;;  %v2544_v53 = vpack.i.bf16 %v1028_v50, %v986_v18  ;;  %v2304_v5 = vor.u32 %v2350_v49, %v2303_v47 }
 0x146   : > { %v838_v54 = vadd.f32 %v3173_v59, %v783_v52 }
 0x147   : > { %2545 = vrot.lane.b32.xlu2 %v2544_v53, %s2860_s11  ;;  %v1298_v19 = vsel %vm755_vm0, %v2304_v5, 0  ;;  %v965_v5 = vsel %vm904_vm5, 0.0, %v905_v17 }
 0x148   : > { %v3234_v55 = vmax.f32 %v838_v54, 0.0  ;;  %1307 = vmatpush.bf16.msra.mxu1 %v1298_v19  ;;  %2354 = vmatpush.bf16.msra.mxu3 %v1298_v19 }
 0x14a   : > { %v914_v58 = vrot.slane %v3234_v55, 7  ;;  %v987_v37 = vrot.slane %v3234_v55, 1 }
 0x14b   : > { %v818_v54 = vpop.f32.mrf.mxu2 }
 0x14d   : > { %v785_v56 = vpop.f32.mrf.mxu0 }
 0x14e   : > { %v839_v57 = vadd.f32 %v3173_v59, %v785_v56 }
 0x150   : > { %v863_v38 = vmax.f32 %v839_v57, 0.0 }
 0x152   : > { %v915_v10 = vrot.slane %v863_v38, 7  ;;  %v988_v9 = vrot.slane %v863_v38, 1  ;;  %v2549_v60 = vpack.i.bf16 %v863_v38, %v3234_v55 }
 0x154   : > { %2550 = vrot.lane.b32.xlu0 %v2549_v60, %s2859_s29  ;;  %v989_v22 = vsel %vm977_vm4, %v987_v37, %v988_v9  ;;  %v1029_v61 = vsel %vm977_vm4, %v988_v9, 0.0  ;;  %v3246_v62 = vsel %vm904_vm5, %v914_v58, %v915_v10 }
 0x155   : > { %v788_v63 = vpop.f32.mrf.mxu0  ;;  %v2554_v3 = vpack.i.bf16 %v1029_v61, %v989_v22 }
 0x156   : > { %v840_v7 = vadd.f32 %v3173_v59, %v788_v63 }
 0x157   : > { %2555 = vrot.lane.b32.xlu1 %v2554_v3, %s2860_s11 }
 0x158   : > { %v3250_v8 = vmax.f32 %v840_v7, 0.0  ;;  %v820_v7 = vpop.f32.mrf.mxu2 }
 0x15a   : > { %v917_v20 = vrot.slane %v3250_v8, 7  ;;  %v990_v13 = vrot.slane %v3250_v8, 1 }
 0x15d   : > { %v790_v11 = vpop.f32.mrf.mxu0 }
 0x15e   : > { %v841_v14 = vadd.f32 %v3173_v59, %v790_v11 }
 0x160   : > { %v865_v12 = vmax.f32 %v841_v14, 0.0 }
 0x162   : > { %v918_v0 = vrot.slane %v865_v12, 7  ;;  %v991_v23 = vrot.slane %v865_v12, 1  ;;  %v2559_v1 = vpack.i.bf16 %v865_v12, %v3250_v8  ;;  %v852_v12 = vadd.f32 %v3173_v59, %v818_v54 }
 0x164   : > { %2560 = vrot.lane.b32.xlu2 %v2559_v1, %s2859_s29  ;;  %v992_v25 = vsel %vm977_vm4, %v990_v13, %v991_v23  ;;  %v1030_v24 = vsel %vm977_vm4, %v991_v23, 0.0  ;;  %v3262_v27 = vsel %vm904_vm5, %v917_v20, %v918_v0  ;;  %v853_v0 = vadd.f32 %v3173_v59, %v820_v7 }
 0x165   : > { %v793_v28 = vpop.f32.mrf.mxu0  ;;  %v2564_v29 = vpack.i.bf16 %v1030_v24, %v992_v25  ;;  %v3312_v24 = vmax.f32 %v852_v12, 0.0 }
 0x166   : > { %v842_v30 = vadd.f32 %v3173_v59, %v793_v28 }
 0x167   : > { %2565 = vrot.lane.b32.xlu0 %v2564_v29, %s2860_s11 }
 0x168   : > { %v3266_v34 = vmax.f32 %v842_v30, 0.0 }
 0x16a   : > { %v920_v39 = vrot.slane %v3266_v34, 7  ;;  %v993_v40 = vrot.slane %v3266_v34, 1 }
 0x16d   : > { %v795_v16 = vpop.f32.mrf.mxu0 }
 0x16e   : > { %v843_v15 = vadd.f32 %v3173_v59, %v795_v16  ;;  %v3315_v16 = vmax.f32 %v853_v0, 0.0 }
 0x170   : > { %v867_v36 = vmax.f32 %v843_v15, 0.0  ;;  %v823_v15 = vpop.f32.mrf.mxu2 }
 0x171   : > { %v854_v17 = vadd.f32 %v3173_v59, %v823_v15 }
 0x172   : > { %v921_v2 = vrot.slane %v867_v36, 7  ;;  %v994_v4 = vrot.slane %v867_v36, 1  ;;  %v2569_v41 = vpack.i.bf16 %v867_v36, %v3266_v34  ;;  %v935_v36 = vrot.slane %v3312_v24, 7 }
 0x174   : > { %2570 = vrot.lane.b32.xlu1 %v2569_v41, %s2859_s29  ;;  %v995_v32 = vsel %vm977_vm4, %v993_v40, %v994_v4  ;;  %v1031_v43 = vsel %vm977_vm4, %v994_v4, 0.0  ;;  %v3278_v31 = vsel %vm904_vm5, %v920_v39, %v921_v2  ;;  %v936_v4 = vrot.slane %v3315_v16, 7 }
 0x175   : > { %v798_v45 = vpop.f32.mrf.mxu0  ;;  %v2574_v46 = vpack.i.bf16 %v1031_v43, %v995_v32 }
 0x176   : > { %v844_v6 = vadd.f32 %v3173_v59, %v798_v45  ;;  %v3331_v49 = vsel %vm904_vm5, %v935_v36, %v936_v4 }
 0x177   : > { %2575 = vrot.lane.b32.xlu2 %v2574_v46, %s2860_s11 }
 0x178   : > { %v3289_v18 = vmax.f32 %v844_v6, 0.0 }
 0x17a   : > { %v923_v56 = vrot.slane %v3289_v18, 7  ;;  %v996_v57 = vrot.slane %v3289_v18, 1 }
 0x17d   : > { %v800_v50 = vpop.f32.mrf.mxu0 }
 0x17e   : > { %v845_v52 = vadd.f32 %v3173_v59, %v800_v50 }
 0x180   : > { %v869_v53 = vmax.f32 %v845_v52, 0.0 }
 0x182   : > { %v924_v38 = vrot.slane %v869_v53, 7  ;;  %v997_v37 = vrot.slane %v869_v53, 1  ;;  %v2579_v10 = vpack.i.bf16 %v869_v53, %v3289_v18 }
 0x184   : > { %2580 = vrot.lane.b32.xlu0 %v2579_v10, %s2859_s29  ;;  %v998_v9 = vsel %vm977_vm4, %v996_v57, %v997_v37  ;;  %v1032_v60 = vsel %vm977_vm4, %v997_v37, 0.0  ;;  %v3301_v22 = vsel %vm904_vm5, %v923_v56, %v924_v38  ;;  %v825_v37 = vpop.f32.mrf.mxu2 }
 0x185   : > { %v803_v61 = vpop.f32.mrf.mxu0  ;;  %v2584_v63 = vpack.i.bf16 %v1032_v60, %v998_v9 }
 0x186   : > { %v846_v3 = vadd.f32 %v3173_v59, %v803_v61  ;;  %v855_v61 = vadd.f32 %v3173_v59, %v825_v37 }
 0x187   : > { %2585 = vrot.lane.b32.xlu1 %v2584_v63, %s2860_s11 }
 0x188   : > { %v3305_v11 = vmax.f32 %v846_v3, 0.0  ;;  %v3353_v0 = vmax.f32 %v855_v61, 0.0 }
 0x18a   : > { %v926_v1 = vrot.slane %v3305_v11, 7  ;;  %v999_v25 = vrot.slane %v3305_v11, 1  ;;  %v1012_v33 = vrot.slane %v3353_v0, 1 }
 0x18d   : > { %v805_v14 = vpop.f32.mrf.mxu0 }
 0x18e   : > { %v847_v13 = vadd.f32 %v3173_v59, %v805_v14 }
 0x190   : > { %v871_v23 = vmax.f32 %v847_v13, 0.0  ;;  %v3351_v13 = vmax.f32 %v854_v17, 0.0 }
 0x192   : > { %v927_v28 = vrot.slane %v871_v23, 7  ;;  %v1000_v29 = vrot.slane %v871_v23, 1  ;;  %v2589_v30 = vpack.i.bf16 %v871_v23, %v3305_v11  ;;  %v2531_v23 = vpop.permute.xlu2 %2530 }
 0x193   : > { %v2533_v4 = vunpack.i.h.bf16 %v2531_v23 }
 0x194   : > { %2590 = vrot.lane.b32.xlu2 %v2589_v30, %s2859_s29  ;;  %v1001_v40 = vsel %vm977_vm4, %v999_v25, %v1000_v29  ;;  %v1033_v2 = vsel %vm977_vm4, %v1000_v29, 0.0  ;;  %v3325_v41 = vsel %vm904_vm5, %v926_v1, %v927_v28 }
 0x195   : > { %v808_v32 = vpop.f32.mrf.mxu0  ;;  %v2594_v43 = vpack.i.bf16 %v1033_v2, %v1001_v40  ;;  %v938_v40 = vrot.slane %v3351_v13, 7  ;;  %v939_v2 = vrot.slane %v3353_v0, 7 }
 0x196   : > { %v2521_v45 = vpop.permute.xlu0 %2520  ;;  %v848_v19 = vadd.f32 %v3173_v59, %v808_v32  ;;  %v2532_v32 = vunpack.i.l.bf16 %v2531_v23 }
 0x197   : > { %v2523_v46 = vunpack.i.h.bf16 %v2521_v45  ;;  %v2522_v47 = vunpack.i.l.bf16 %v2521_v45  ;;  %2595 = vrot.lane.b32.xlu0 %v2594_v43, %s2860_s11 }
 0x198   : > { %v3342_v60 = vmax.f32 %v848_v19, 0.0 }
 0x199   : > { %v2526_v6 = vpop.permute.xlu1 %2525  ;;  %v1194_v53 = vsel %vm649_vm1, %v965_v5, %v2522_v47  ;;  %v1195_v54 = vsel %vm649_vm1, %v3197_v26, %v2523_v46  ;;  %v3370_v46 = vsel %vm904_vm5, %v938_v40, %v939_v2  ;;  %v966_v47 = vsel %vm904_vm5, 0.0, %v908_v35 }
 0x19a   : > { %v2528_v50 = vunpack.i.h.bf16 %v2526_v6  ;;  %v2527_v52 = vunpack.i.l.bf16 %v2526_v6  ;;  %v929_v26 = vrot.slane %v3342_v60, 7  ;;  %v1002_v3 = vrot.slane %v3342_v60, 1 }
 0x19b   : > { %v1196_v19 = vsel %vm649_vm1, %v966_v47, %v2532_v32 }
 0x19c   : > { %v1218_v57 = vsel %vm674_vm2, %v1194_v53, %v2527_v52  ;;  %v1219_v38 = vsel %vm674_vm2, %v1195_v54, %v2528_v50  ;;  %v1197_v50 = vsel %vm649_vm1, %v3214_v42, %v2533_v4  ;;  %v2619_v52 = vpack.i.bf16 %v3315_v16, %v3312_v24 }
 0x19d   : > { %v810_v10 = vpop.f32.mrf.mxu0  ;;  %v1242_v9 = vpack.c.bf16 %v1219_v38, %v1218_v57  ;;  %v1011_v57 = vrot.slane %v3351_v13, 1 }
 0x19e   : > { %v849_v21 = vadd.f32 %v3173_v59, %v810_v10 }
 0x19f   : > { %2305 = vmatmul.msk.bf16.vlgmr.msra.gmra.mxu1 %vm718_vm3, %v1242_v9  ;;  %v1013_v9 = vsel %vm977_vm4, %v1011_v57, %v1012_v33  ;;  %v2629_v57 = vpack.i.bf16 %v3353_v0, %v3351_v13 }
 0x1a0   : > { %v873_v63 = vmax.f32 %v849_v21, 0.0  ;;  %v1037_v21 = vsel %vm977_vm4, %v1012_v33, 0.0 }
 0x1a2   : > { %v930_v7 = vrot.slane %v873_v63, 7  ;;  %v1003_v14 = vrot.slane %v873_v63, 1  ;;  %v2599_v12 = vpack.i.bf16 %v873_v63, %v3342_v60 }
 0x1a4   : > { %v1004_v25 = vsel %vm977_vm4, %v1002_v3, %v1003_v14  ;;  %v1034_v28 = vsel %vm977_vm4, %v1003_v14, 0.0  ;;  %v3360_v29 = vsel %vm904_vm5, %v929_v26, %v930_v7  ;;  %2600 = vrot.lane.b32.xlu1 %v2599_v12, %s2859_s29  ;;  %v1008_v14 = vrot.slane %v3312_v24, 1 }
 0x1a5   : > { %v813_v30 = vpop.f32.mrf.mxu0  ;;  %v2604_v15 = vpack.i.bf16 %v1034_v28, %v1004_v25  ;;  %v2634_v12 = vpack.i.bf16 %v1037_v21, %v1013_v9 }
 0x1a6   : > { %v850_v43 = vadd.f32 %v3173_v59, %v813_v30  ;;  %v2546_v30 = vpop.permute.xlu2 %2545 }
 0x1a7   : > { %2605 = vrot.lane.b32.xlu2 %v2604_v15, %s2860_s11  ;;  %v2548_v47 = vunpack.i.h.bf16 %v2546_v30 }
 0x1a8   : > { %v3384_v38 = vmax.f32 %v850_v43, 0.0 }
 0x1a9   : > { %v2536_v45 = vpop.permute.xlu0 %2535 }
 0x1aa   : > { %v2538_v6 = vunpack.i.h.bf16 %v2536_v45  ;;  %v2537_v5 = vunpack.i.l.bf16 %v2536_v45  ;;  %v932_v17 = vrot.slane %v3384_v38, 7  ;;  %v1005_v61 = vrot.slane %v3384_v38, 1 }
 0x1ab   : > { %v967_v45 = vsel %vm904_vm5, 0.0, %v911_v48 }
 0x1ac   : > { %v1220_v53 = vsel %vm674_vm2, %v1196_v19, %v2537_v5  ;;  %v1221_v54 = vsel %vm674_vm2, %v1197_v50, %v2538_v6  ;;  %v2547_v6 = vunpack.i.l.bf16 %v2546_v30 }
 0x1ad   : > { %v815_v35 = vpop.f32.mrf.mxu0  ;;  %v1243_v37 = vpack.c.bf16 %v1221_v54, %v1220_v53 }
 0x1ae   : > { %v851_v10 = vadd.f32 %v3173_v59, %v815_v35  ;;  %v1009_v59 = vrot.slane %v3315_v16, 1 }
 0x1af   : > { %2306 = vmatmul.msk.bf16.gmra.mxu1 %vm718_vm3, %v1243_v37  ;;  %2620 = vrot.lane.b32.xlu2 %v2619_v52, %s2859_s29 }
 0x1b0   : > { %v875_v42 = vmax.f32 %v851_v10, 0.0  ;;  %v1010_v16 = vsel %vm977_vm4, %v1008_v14, %v1009_v59  ;;  %v1036_v43 = vsel %vm977_vm4, %v1009_v59, 0.0 }
 0x1b1   : > { %v2624_v50 = vpack.i.bf16 %v1036_v43, %v1010_v16 }
 0x1b2   : > { %v933_v63 = vrot.slane %v875_v42, 7  ;;  %v1006_v3 = vrot.slane %v875_v42, 1  ;;  %v2609_v7 = vpack.i.bf16 %v875_v42, %v3384_v38  ;;  %v975_v38 = vsel %vm904_vm5, 0.0, %v935_v36 }
 0x1b4   : > { %2610 = vrot.lane.b32.xlu0 %v2609_v7, %s2859_s29  ;;  %v1007_v23 = vsel %vm977_vm4, %v1005_v61, %v1006_v3  ;;  %v1035_v25 = vsel %vm977_vm4, %v1006_v3, 0.0  ;;  %v3402_v28 = vsel %vm904_vm5, %v932_v17, %v933_v63 }
 0x1b5   : > { %v2614_v15 = vpack.i.bf16 %v1035_v25, %v1007_v23 }
 0x1b6   : > { %v2541_v2 = vpop.permute.xlu1 %2540 }
 0x1b7   : > { %v2543_v4 = vunpack.i.h.bf16 %v2541_v2  ;;  %v2542_v32 = vunpack.i.l.bf16 %v2541_v2  ;;  %2615 = vrot.lane.b32.xlu1 %v2614_v15, %s2860_s11  ;;  %2635 = vrot.lane.b32.xlu2 %v2634_v12, %s2860_s11 }
 0x1b9   : > { %v1198_v5 = vsel %vm649_vm1, %v967_v45, %v2542_v32  ;;  %v1199_v19 = vsel %vm649_vm1, %v3230_v51, %v2543_v4  ;;  %v968_v51 = vsel %vm904_vm5, 0.0, %v914_v58  ;;  %v969_v58 = vsel %vm904_vm5, 0.0, %v917_v20 }
 0x1ba   : > { %v1222_v52 = vsel %vm674_vm2, %v1198_v5, %v2547_v6  ;;  %v1223_v53 = vsel %vm674_vm2, %v1199_v19, %v2548_v47  ;;  %v970_v20 = vsel %vm904_vm5, 0.0, %v920_v39  ;;  %v971_v39 = vsel %vm904_vm5, 0.0, %v923_v56 }
 0x1bb   : > { %v1244_v54 = vpack.c.bf16 %v1223_v53, %v1222_v52  ;;  %v972_v56 = vsel %vm904_vm5, 0.0, %v926_v1  ;;  %v973_v1 = vsel %vm904_vm5, 0.0, %v929_v26 }
 0x1bc   : > { %2625 = vrot.lane.b32.xlu0 %v2624_v50, %s2860_s11 }
 0x1be   : > { %v2561_v63 = vpop.permute.xlu2 %2560 }
 0x1bf   : > { %2307 = vmatmul.msk.bf16.gmra.mxu1 %vm718_vm3, %v1244_v54  ;;  %2630 = vrot.lane.b32.xlu1 %v2629_v57, %s2859_s29  ;;  %v2563_v3 = vunpack.i.h.bf16 %v2561_v63  ;;  %v2562_v7 = vunpack.i.l.bf16 %v2561_v63 }
 0x1c1   : > { %v1202_v12 = vsel %vm649_vm1, %v969_v58, %v2562_v7 }
 0x1c6   : > { %v2551_v44 = vpop.permute.xlu0 %2550 }
 0x1c7   : > { %v2553_v48 = vunpack.i.h.bf16 %v2551_v44  ;;  %v2552_v33 = vunpack.i.l.bf16 %v2551_v44 }
 0x1c9   : > { %v2556_v35 = vpop.permute.xlu1 %2555  ;;  %v1200_v42 = vsel %vm649_vm1, %v968_v51, %v2552_v33  ;;  %v1201_v0 = vsel %vm649_vm1, %v3246_v62, %v2553_v48  ;;  %v1203_v62 = vsel %vm649_vm1, %v3262_v27, %v2563_v3 }
 0x1ca   : > { %v2558_v37 = vunpack.i.h.bf16 %v2556_v35  ;;  %v2557_v10 = vunpack.i.l.bf16 %v2556_v35 }
 0x1cc   : > { %v1224_v9 = vsel %vm674_vm2, %v1200_v42, %v2557_v10  ;;  %v1225_v21 = vsel %vm674_vm2, %v1201_v0, %v2558_v37 }
 0x1cd   : > { %v1245_v61 = vpack.c.bf16 %v1225_v21, %v1224_v9 }
 0x1cf   : > { %2308 = vmatmul.msk.bf16.gmra.mxu1 %vm718_vm3, %v1245_v61 }
 0x1d1   : > { %v2576_v15 = vpop.permute.xlu2 %2575 }
 0x1d2   : > { %v2578_v32 = vunpack.i.h.bf16 %v2576_v15  ;;  %v2577_v16 = vunpack.i.l.bf16 %v2576_v15 }
 0x1d9   : > { %v2566_v55 = vpop.permute.xlu0 %2565 }
 0x1da   : > { %v2568_v14 = vunpack.i.h.bf16 %v2566_v55  ;;  %v2567_v59 = vunpack.i.l.bf16 %v2566_v55 }
 0x1dc   : > { %v1226_v23 = vsel %vm674_vm2, %v1202_v12, %v2567_v59  ;;  %v1227_v25 = vsel %vm674_vm2, %v1203_v62, %v2568_v14 }
 0x1dd   : > { %v1246_v30 = vpack.c.bf16 %v1227_v25, %v1226_v23 }
 0x1df   : > { %2309 = vmatmul.msk.bf16.gmra.mxu1 %vm718_vm3, %v1246_v30 }
 0x1e6   : > { %v2571_v2 = vpop.permute.xlu1 %2570 }
 0x1e7   : > { %v2573_v4 = vunpack.i.h.bf16 %v2571_v2  ;;  %v2572_v8 = vunpack.i.l.bf16 %v2571_v2 }
 0x1e9   : > { %v1204_v43 = vsel %vm649_vm1, %v970_v20, %v2572_v8  ;;  %v1205_v27 = vsel %vm649_vm1, %v3278_v31, %v2573_v4 }
 0x1ea   : > { %v1228_v45 = vsel %vm674_vm2, %v1204_v43, %v2577_v16  ;;  %v1229_v47 = vsel %vm674_vm2, %v1205_v27, %v2578_v32 }
 0x1eb   : > { %v1247_v6 = vpack.c.bf16 %v1229_v47, %v1228_v45 }
 0x1ee   : > { %v2591_v33 = vpop.permute.xlu2 %2590 }
 0x1ef   : > { %2310 = vmatmul.msk.bf16.gmra.mxu1 %vm718_vm3, %v1247_v6  ;;  %v2593_v35 = vunpack.i.h.bf16 %v2591_v33  ;;  %v2592_v51 = vunpack.i.l.bf16 %v2591_v33 }
 0x1f1   : > { %v1208_v42 = vsel %vm649_vm1, %v972_v56, %v2592_v51 }
 0x1f6   : > { %v2581_v5 = vpop.permute.xlu0 %2580 }
 0x1f7   : > { %v2583_v19 = vunpack.i.h.bf16 %v2581_v5  ;;  %v2582_v50 = vunpack.i.l.bf16 %v2581_v5 }
 0x1f9   : > { %v2586_v34 = vpop.permute.xlu1 %2585  ;;  %v1206_v54 = vsel %vm649_vm1, %v971_v39, %v2582_v50  ;;  %v1207_v31 = vsel %vm649_vm1, %v3301_v22, %v2583_v19  ;;  %v1209_v22 = vsel %vm649_vm1, %v3325_v41, %v2593_v35 }
 0x1fa   : > { %v2588_v52 = vunpack.i.h.bf16 %v2586_v34  ;;  %v2587_v53 = vunpack.i.l.bf16 %v2586_v34 }
 0x1fc   : > { %v1230_v57 = vsel %vm674_vm2, %v1206_v54, %v2587_v53  ;;  %v1231_v44 = vsel %vm674_vm2, %v1207_v31, %v2588_v52  ;;  %v1423_v53 = vlaneseq  ;;  %v976_v31 = vsel %vm904_vm5, 0.0, %v938_v40 }
 0x1fd   : > { %v1248_v48 = vpack.c.bf16 %v1231_v44, %v1230_v57  ;;  %v3512_v40 = vstv %s2318_s26 }
 0x1ff   : > { %2311 = vmatmul.msk.bf16.gmra.mxu1 %vm718_vm3, %v1248_v48 }
 0x201   : > { %v2606_v61 = vpop.permute.xlu2 %2605 }
 0x202   : > { %v2608_v7 = vunpack.i.h.bf16 %v2606_v61  ;;  %v2607_v55 = vunpack.i.l.bf16 %v2606_v61 }
 0x209   : > { %v2596_v18 = vpop.permute.xlu0 %2595  ;;  %v2621_v30 = vpop.permute.xlu2 %2620 }
 0x20a   : > { %v2598_v37 = vunpack.i.h.bf16 %v2596_v18  ;;  %v2597_v10 = vunpack.i.l.bf16 %v2596_v18  ;;  %v2623_v32 = vunpack.i.h.bf16 %v2621_v30  ;;  %v2622_v16 = vunpack.i.l.bf16 %v2621_v30 }
 0x20b   : > { %v3510_v18 = vshrl.u32 %v1423_v53, 7 }
 0x20c   : > { %v1232_v0 = vsel %vm674_vm2, %v1208_v42, %v2597_v10  ;;  %v1233_v9 = vsel %vm674_vm2, %v1209_v22, %v2598_v37  ;;  %v1214_v19 = vsel %vm649_vm1, %v975_v38, %v2622_v16  ;;  %v2861_v42 = vmov 0.0  }
 0x20d   : > { %v1249_v21 = vpack.c.bf16 %v1233_v9, %v1232_v0  ;;  %v1427_v56 = vadd.s32 %v3512_v40, %v3510_v18 }
 0x20f   : > { %2312 = vmatmul.msk.bf16.gmra.mxu1 %vm718_vm3, %v1249_v21  ;;  %vm1429_vm6 = vcmp.ge.s32.totalorder %v1427_v56, 0  ;;  %vm1431_vm7 = vcmp.lt.s32.totalorder %v1427_v56, 16 }
 0x210   : > { %vm1433_vm8 = vmand %vm1429_vm6, %vm1431_vm7 }
 0x211   : > { %v2636_v50 = vpop.permute.xlu2 %2635  ;;  %v3523_v22 = vsel %vm1433_vm8, 1.0, %v2861_v42 }
 0x212   : > { %v2638_v57 = vunpack.i.h.bf16 %v2636_v50  ;;  %v2637_v44 = vunpack.i.l.bf16 %v2636_v50  ;;  %v1441_v21 = vperm.slane %v3523_v22, 2 }
 0x216   : > { %v2601_v63 = vpop.permute.xlu1 %2600 }
 0x217   : > { %v2603_v3 = vunpack.i.h.bf16 %v2601_v63  ;;  %v2602_v11 = vunpack.i.l.bf16 %v2601_v63 }
 0x219   : > { %v1210_v58 = vsel %vm649_vm1, %v973_v1, %v2602_v11  ;;  %v1211_v41 = vsel %vm649_vm1, %v3360_v29, %v2603_v3  ;;  %v974_v29 = vsel %vm904_vm5, 0.0, %v932_v17 }
 0x21a   : > { %v1234_v14 = vsel %vm674_vm2, %v1210_v58, %v2607_v55  ;;  %v1235_v59 = vsel %vm674_vm2, %v1211_v41, %v2608_v7 }
 0x21b   : > { %v1250_v62 = vpack.c.bf16 %v1235_v59, %v1234_v14  ;;  %v1442_v14 = vperm.slane %v3523_v22, 3 }
 0x21c   : > { %v3474_v12 = vpop.f32.mrf.mxu1 }
 0x21f   : > { %2313 = vmatmul.msk.bf16.gmra.mxu1 %vm718_vm3, %v1250_v62 }
 0x224   : > { %v3477_v23 = vpop.f32.mrf.mxu1 }
 0x226   : > { %v2611_v60 = vpop.permute.xlu0 %2610 }
 0x227   : > { %v2613_v26 = vunpack.i.h.bf16 %v2611_v60  ;;  %v2612_v25 = vunpack.i.l.bf16 %v2611_v60 }
 0x229   : > { %v2616_v15 = vpop.permute.xlu1 %2615  ;;  %v1212_v8 = vsel %vm649_vm1, %v974_v29, %v2612_v25  ;;  %v1213_v20 = vsel %vm649_vm1, %v3402_v28, %v2613_v26  ;;  %v1215_v28 = vsel %vm649_vm1, %v3331_v49, %v2623_v32 }
 0x22a   : > { %v2618_v2 = vunpack.i.h.bf16 %v2616_v15  ;;  %v2617_v4 = vunpack.i.l.bf16 %v2616_v15 }
 0x22c   : > { %v3485_v43 = vpop.f32.mrf.mxu1  ;;  %v1236_v27 = vsel %vm674_vm2, %v1212_v8, %v2617_v4  ;;  %v1237_v45 = vsel %vm674_vm2, %v1213_v20, %v2618_v2  ;;  %v1443_v4 = vperm.slane %v3523_v22, 4 }
 0x22d   : > { %v1251_v47 = vpack.c.bf16 %v1237_v45, %v1236_v27 }
 0x22e   : > { %v2626_v6 = vpop.permute.xlu0 %2625 }
 0x22f   : > { %v2628_v17 = vunpack.i.h.bf16 %v2626_v6  ;;  %v2627_v5 = vunpack.i.l.bf16 %v2626_v6  ;;  %2314 = vmatmul.msk.bf16.gmra.mxu1 %vm718_vm3, %v1251_v47 }
 0x231   : > { %v2631_v34 = vpop.permute.xlu1 %2630  ;;  %v1238_v39 = vsel %vm674_vm2, %v1214_v19, %v2627_v5  ;;  %v1239_v52 = vsel %vm674_vm2, %v1215_v28, %v2628_v17  ;;  %v1444_v17 = vperm.slane %v3523_v22, 5 }
 0x232   : > { %v2633_v24 = vunpack.i.h.bf16 %v2631_v34  ;;  %v2632_v54 = vunpack.i.l.bf16 %v2631_v34  ;;  %v1252_v36 = vpack.c.bf16 %v1239_v52, %v1238_v39 }
 0x234   : > { %v1217_v49 = vsel %vm649_vm1, %v3370_v46, %v2633_v24  ;;  %v1216_v48 = vsel %vm649_vm1, %v976_v31, %v2632_v54  ;;  %v3505_v33 = vpop.f32.mrf.mxu1  ;;  %2315 = vmatmul.msk.bf16.vlgmr.msra.gmra.mxu3 %vm718_vm3, %v1252_v36  ;;  %v3519_v46 = vld [vmem:[%s3984_s5] ss:$0 sm:$0xff]  ;;  %v1445_v54 = vperm.slane %v3523_v22, 6 }
 0x235   : > { %v1240_v35 = vsel %vm674_vm2, %v1216_v48, %v2637_v44  ;;  %v1241_v51 = vsel %vm674_vm2, %v1217_v49, %v2638_v57 }
 0x236   : > { %v1253_v13 = vpack.c.bf16 %v1241_v51, %v1240_v35 }
 0x23c   : > { %v1319_v37 = vpop.f32.mrf.mxu1 }
 0x23d   : > { %v1377_v10 = vadd.f32 %v3519_v46, %v1319_v37  ;;  %v1446_v37 = vperm.slane %v3523_v22, 7 }
 0x23f   : > { %v1401_v9 = vmax.f32 %v1377_v10, 0.0 }
 0x241   : > { %v3528_v3 = vmul.f32 %v1441_v21, %v1401_v9 }
 0x244   : > { %v1321_v0 = vpop.f32.mrf.mxu1  ;;  %2316 = vmatmul.msk.bf16.gmra.mxu3 %vm718_vm3, %v1253_v13  ;;  %v1425_v13 = vadd.s32 8, %v3510_v18 }
 0x245   : > { %v1378_v61 = vadd.f32 %v3519_v46, %v1321_v0 }
 0x246   : > { %v1428_v9 = vadd.s32 %v3512_v40, %v1425_v13  ;;  %v2323_v40 = vld [vmem:[%s3985_s6] sm:$0xf] }
 0x247   : > { %v1402_v63 = vmax.f32 %v1378_v61, 0.0 }
 0x248   : > { %vm1430_vm9 = vcmp.ge.s32.totalorder %v1428_v9, 0  ;;  %vm1432_vm10 = vcmp.lt.s32.totalorder %v1428_v9, 16 }
 0x249   : > { %v3530_v11 = vmul.f32 %v1441_v21, %v1402_v63  ;;  %vm1434_vm11 = vmand %vm1430_vm9, %vm1432_vm10 }
 0x24b   : > { %v2639_v1 = vpack.i.bf16 %v3530_v11, %v3528_v3 }
 0x24c   : > { %v1324_v7 = vpop.f32.mrf.mxu1 }
 0x24d   : > { %2640 = vrot.lane.b32.xlu0 %v2639_v1, %s2859_s29  ;;  %v1379_v55 = vadd.f32 %v3519_v46, %v1324_v7  ;;  %v2320_v7 = vsel %vm1434_vm11, 1.0, %v2861_v42 }
 0x24e   : > { %v1450_v13 = vperm.slane %v2320_v7, 3 }
 0x24f   : > { %v1403_v41 = vmax.f32 %v1379_v55, 0.0 }
 0x251   : > { %v3538_v60 = vmul.f32 %v1442_v14, %v1403_v41 }
 0x254   : > { %v1326_v58 = vpop.f32.mrf.mxu1 }
 0x255   : > { %v1380_v59 = vadd.f32 %v3519_v46, %v1326_v58  ;;  %v2351_v58 = vld [vmem:[%s3985_s6] sm:$0x30] }
 0x257   : > { %v1404_v62 = vmax.f32 %v1380_v59, 0.0 }
 0x259   : > { %v3540_v26 = vmul.f32 %v1442_v14, %v1404_v62  ;;  %v1447_v14 = vperm.slane %v2320_v7, 0  ;;  %v2324_v62 = vor.u32 %v2351_v58, %v2323_v40  ;;  %v1439_v40 = vperm.slane %v3523_v22, 0 }
 0x25b   : > { %v2649_v25 = vpack.i.bf16 %v3540_v26, %v3538_v60 }
 0x25c   : > { %v1329_v30 = vpop.f32.mrf.mxu1 }
 0x25d   : > { %2650 = vrot.lane.b32.xlu2 %v2649_v25, %s2859_s29  ;;  %v1381_v15 = vadd.f32 %v3519_v46, %v1329_v30  ;;  %v1663_v30 = vsel %vm755_vm0, %v2324_v62, 0 }
 0x25e   : > { %1672 = vmatpush.bf16.msrb.mxu2 %v1663_v30 }
 0x25f   : > { %v1405_v2 = vmax.f32 %v1381_v15, 0.0 }
 0x261   : > { %v3548_v32 = vmul.f32 %v1443_v4, %v1405_v2 }
 0x264   : > { %v1331_v29 = vpop.f32.mrf.mxu1 }
 0x265   : > { %v1382_v8 = vadd.f32 %v3519_v46, %v1331_v29 }
 0x267   : > { %v1406_v20 = vmax.f32 %v1382_v8, 0.0 }
 0x269   : > { %v3550_v16 = vmul.f32 %v1443_v4, %v1406_v20 }
 0x26b   : > { %v2644_v27 = vpack.i.bf16 %v3550_v16, %v3548_v32 }
 0x26c   : > { %v1334_v45 = vpop.f32.mrf.mxu1 }
 0x26d   : > { %2645 = vrot.lane.b32.xlu1 %v2644_v27, %s2860_s11  ;;  %v1383_v47 = vadd.f32 %v3519_v46, %v1334_v45 }
 0x26f   : > { %v1407_v38 = vmax.f32 %v1383_v47, 0.0 }
 0x271   : > { %v3559_v19 = vmul.f32 %v1444_v17, %v1407_v38 }
 0x274   : > { %v1336_v6 = vpop.f32.mrf.mxu1 }
 0x275   : > { %v1384_v5 = vadd.f32 %v3519_v46, %v1336_v6  ;;  %2660 = vrot.lane.b32.xlu1 %v2644_v27, %s2859_s29  ;;  %v1448_v27 = vperm.slane %v2320_v7, 1 }
 0x277   : > { %v1408_v28 = vmax.f32 %v1384_v5, 0.0 }
 0x279   : > { %v3561_v50 = vmul.f32 %v1444_v17, %v1408_v28 }
 0x27b   : > { %v2654_v34 = vpack.i.bf16 %v3561_v50, %v3559_v19 }
 0x27c   : > { %v1339_v39 = vpop.f32.mrf.mxu1 }
 0x27d   : > { %2655 = vrot.lane.b32.xlu0 %v2654_v34, %s2860_s11  ;;  %v1385_v52 = vadd.f32 %v3519_v46, %v1339_v39 }
 0x27f   : > { %v1409_v24 = vmax.f32 %v1385_v52, 0.0  ;;  %v1449_v52 = vperm.slane %v2320_v7, 2 }
 0x281   : > { %v3570_v57 = vmul.f32 %v1445_v54, %v1409_v24 }
 0x284   : > { %v1341_v53 = vpop.f32.mrf.mxu1 }
 0x285   : > { %v1386_v36 = vadd.f32 %v3519_v46, %v1341_v53  ;;  %2670 = vrot.lane.b32.xlu0 %v2654_v34, %s2859_s29 }
 0x287   : > { %v1410_v31 = vmax.f32 %v1386_v36, 0.0 }
 0x289   : > { %v3572_v44 = vmul.f32 %v1445_v54, %v1410_v31 }
 0x28b   : > { %v2664_v49 = vpack.i.bf16 %v3572_v44, %v3570_v57 }
 0x28c   : > { %v1344_v48 = vpop.f32.mrf.mxu1 }
 0x28d   : > { %2665 = vrot.lane.b32.xlu2 %v2664_v49, %s2860_s11  ;;  %v1387_v35 = vadd.f32 %v3519_v46, %v1344_v48 }
 0x28f   : > { %v1411_v56 = vmax.f32 %v1387_v35, 0.0 }
 0x291   : > { %v3583_v21 = vmul.f32 %v1446_v37, %v1411_v56 }
 0x294   : > { %v1346_v51 = vpop.f32.mrf.mxu1 }
 0x295   : > { %v1388_v10 = vadd.f32 %v3519_v46, %v1346_v51  ;;  %2680 = vrot.lane.b32.xlu2 %v2664_v49, %s2859_s29 }
 0x297   : > { %v1412_v0 = vmax.f32 %v1388_v10, 0.0 }
 0x299   : > { %v3585_v61 = vmul.f32 %v1446_v37, %v1412_v0 }
 0x29b   : > { %v2674_v63 = vpack.i.bf16 %v3585_v61, %v3583_v21 }
 0x29c   : > { %v1349_v1 = vpop.f32.mrf.mxu1 }
 0x29d   : > { %2675 = vrot.lane.b32.xlu1 %v2674_v63, %s2860_s11  ;;  %v1389_v18 = vadd.f32 %v3519_v46, %v1349_v1  ;;  %v1374_v1 = vadd.f32 %v3519_v46, %v3477_v23 }
 0x29f   : > { %v1413_v41 = vmax.f32 %v1389_v18, 0.0  ;;  %v1398_v58 = vmax.f32 %v1374_v1, 0.0 }
 0x2a1   : > { %v1467_v42 = vmul.f32 %v1447_v14, %v1413_v41 }
 0x2a4   : > { %v1351_v55 = vpop.f32.mrf.mxu1 }
 0x2a5   : > { %v1390_v59 = vadd.f32 %v3519_v46, %v1351_v55  ;;  %2690 = vrot.lane.b32.xlu1 %v2674_v63, %s2859_s29  ;;  %v1373_v63 = vadd.f32 %v3519_v46, %v3474_v12 }
 0x2a7   : > { %v1414_v25 = vmax.f32 %v1390_v59, 0.0  ;;  %v1397_v55 = vmax.f32 %v1373_v63, 0.0  ;;  %v1452_v59 = vmul.f32 %v1439_v40, %v1398_v58 }
 0x2a9   : > { %v1468_v15 = vmul.f32 %v1447_v14, %v1414_v25  ;;  %v1451_v14 = vmul.f32 %v1439_v40, %v1397_v55 }
 0x2ab   : > { %v2684_v29 = vpack.i.bf16 %v1468_v15, %v1467_v42 }
 0x2ac   : > { %v1354_v2 = vpop.f32.mrf.mxu1 }
 0x2ad   : > { %2685 = vrot.lane.b32.xlu0 %v2684_v29, %s2860_s11  ;;  %v1391_v4 = vadd.f32 %v3519_v46, %v1354_v2  ;;  %v1375_v2 = vadd.f32 %v3519_v46, %v3485_v43 }
 0x2af   : > { %v1415_v20 = vmax.f32 %v1391_v4, 0.0  ;;  %v1376_v4 = vadd.f32 %v3519_v46, %v3505_v33 }
 0x2b1   : > { %v1469_v38 = vmul.f32 %v1448_v27, %v1415_v20  ;;  %v1399_v20 = vmax.f32 %v1375_v2, 0.0 }
 0x2b4   : > { %v1356_v8 = vpop.f32.mrf.mxu1 }
 0x2b5   : > { %v1392_v45 = vadd.f32 %v3519_v46, %v1356_v8  ;;  %2700 = vrot.lane.b32.xlu0 %v2684_v29, %s2859_s29 }
 0x2b7   : > { %v1416_v47 = vmax.f32 %v1392_v45, 0.0  ;;  %v1359_v6 = vpop.f32.mrf.mxu3  ;;  %v2651_v8 = vpop.permute.xlu2 %2650  ;;  %v1400_v45 = vmax.f32 %v1376_v4, 0.0 }
 0x2b8   : > { %v1393_v28 = vadd.f32 %v3519_v46, %v1359_v6  ;;  %v2652_v6 = vunpack.i.l.bf16 %v2651_v8 }
 0x2b9   : > { %v1470_v17 = vmul.f32 %v1448_v27, %v1416_v47  ;;  %v1440_v27 = vperm.slane %v3523_v22, 1  ;;  %v2653_v47 = vunpack.i.h.bf16 %v2651_v8 }
 0x2ba   : > { %v1417_v39 = vmax.f32 %v1393_v28, 0.0 }
 0x2bb   : > { %v2694_v5 = vpack.i.bf16 %v1470_v17, %v1469_v38  ;;  %v1453_v38 = vmul.f32 %v1440_v27, %v1399_v20  ;;  %v1454_v17 = vmul.f32 %v1440_v27, %v1400_v45 }
 0x2bc   : > { %v1471_v54 = vmul.f32 %v1449_v52, %v1417_v39 }
 0x2bd   : > { %2695 = vrot.lane.b32.xlu2 %v2694_v5, %s2860_s11  ;;  %v1594_v39 = vsel %vm649_vm1, %v1454_v17, %v2653_v47 }
 0x2bf   : > { %v1361_v34 = vpop.f32.mrf.mxu3  ;;  %v2641_v18 = vpop.permute.xlu0 %2640 }
 0x2c0   : > { %v1394_v53 = vadd.f32 %v3519_v46, %v1361_v34  ;;  %v2643_v7 = vunpack.i.h.bf16 %v2641_v18  ;;  %v2642_v41 = vunpack.i.l.bf16 %v2641_v18 }
 0x2c2   : > { %v1418_v24 = vmax.f32 %v1394_v53, 0.0  ;;  %v1592_v42 = vsel %vm649_vm1, %v1452_v59, %v2643_v7  ;;  %v1591_v12 = vsel %vm649_vm1, %v1451_v14, %v2642_v41 }
 0x2c4   : > { %v1472_v36 = vmul.f32 %v1449_v52, %v1418_v24  ;;  %v1593_v52 = vsel %vm649_vm1, %v1453_v38, %v2652_v6 }
 0x2c5   : > { %2710 = vrot.lane.b32.xlu2 %v2694_v5, %s2859_s29 }
 0x2c6   : > { %v2704_v31 = vpack.i.bf16 %v1472_v36, %v1471_v54 }
 0x2c7   : > { %v1364_v49 = vpop.f32.mrf.mxu3 }
 0x2c8   : > { %2705 = vrot.lane.b32.xlu1 %v2704_v31, %s2860_s11  ;;  %v1395_v48 = vadd.f32 %v3519_v46, %v1364_v49 }
 0x2ca   : > { %v1419_v51 = vmax.f32 %v1395_v48, 0.0 }
 0x2cc   : > { %v1473_v10 = vmul.f32 %v1450_v13, %v1419_v51 }
 0x2cf   : > { %v1366_v35 = vpop.f32.mrf.mxu3 }
 0x2d0   : > { %v1396_v56 = vadd.f32 %v3519_v46, %v1366_v35 }
 0x2d2   : > { %v1420_v37 = vmax.f32 %v1396_v56, 0.0 }
 0x2d4   : > { %v1474_v0 = vmul.f32 %v1450_v13, %v1420_v37 }
 0x2d6   : > { %v2714_v9 = vpack.i.bf16 %v1474_v0, %v1473_v10 }
 0x2d8   : > { %2715 = vrot.lane.b32.xlu0 %v2714_v9, %s2860_s11 }
 0x2df   : > { %v2646_v62 = vpop.permute.xlu1 %2645 }
 0x2e0   : > { %v2648_v25 = vunpack.i.h.bf16 %v2646_v62  ;;  %v2647_v30 = vunpack.i.l.bf16 %v2646_v62 }
 0x2e2   : > { %v1608_v23 = vsel %vm674_vm2, %v1592_v42, %v2648_v25  ;;  %v1607_v15 = vsel %vm674_vm2, %v1591_v12, %v2647_v30 }
 0x2e3   : > { %v1623_v29 = vpack.c.bf16 %v1608_v23, %v1607_v15 }
 0x2e5   : > { %2325 = vmatmul.msk.bf16.vlgmr.msrb.gmra.mxu2 %vm718_vm3, %v1623_v29 }
 0x2e7   : > { %v2661_v22 = vpop.permute.xlu1 %2660  ;;  %v2666_v53 = vpop.permute.xlu2 %2665 }
 0x2e8   : > { %v2663_v24 = vunpack.i.h.bf16 %v2661_v22  ;;  %v2662_v54 = vunpack.i.l.bf16 %v2661_v22  ;;  %v2668_v36 = vunpack.i.h.bf16 %v2666_v53  ;;  %v2667_v31 = vunpack.i.l.bf16 %v2666_v53 }
 0x2ea   : > { %v1596_v49 = vsel %vm649_vm1, %v3530_v11, %v2663_v24  ;;  %v1595_v48 = vsel %vm649_vm1, %v3528_v3, %v2662_v54 }
 0x2eb   : > { %v1611_v35 = vsel %vm674_vm2, %v1595_v48, %v2667_v31  ;;  %v1612_v51 = vsel %vm674_vm2, %v1596_v49, %v2668_v36  ;;  %v3678_v31 = vld [vmem:[%s3986_s7] ss:$0 sm:$0xff] }
 0x2ec   : > { %v1625_v13 = vpack.c.bf16 %v1612_v51, %v1611_v35 }
 0x2ef   : > { %v2656_v5 = vpop.permute.xlu0 %2655  ;;  %v2681_v40 = vpop.permute.xlu2 %2680 }
 0x2f0   : > { %v2658_v28 = vunpack.i.h.bf16 %v2656_v5  ;;  %v2657_v34 = vunpack.i.l.bf16 %v2656_v5  ;;  %v2683_v58 = vunpack.i.h.bf16 %v2681_v40  ;;  %v2682_v7 = vunpack.i.l.bf16 %v2681_v40 }
 0x2f2   : > { %v1609_v43 = vsel %vm674_vm2, %v1593_v52, %v2657_v34  ;;  %v1610_v33 = vsel %vm674_vm2, %v1594_v39, %v2658_v28  ;;  %v1600_v62 = vsel %vm649_vm1, %v3550_v16, %v2683_v58 }
 0x2f3   : > { %v1624_v46 = vpack.c.bf16 %v1610_v33, %v1609_v43 }
 0x2f5   : > { %2326 = vmatmul.msk.bf16.gmra.mxu2 %vm718_vm3, %v1624_v46 }
 0x2f7   : > { %v2671_v56 = vpop.permute.xlu0 %2670 }
 0x2f8   : > { %v2673_v37 = vunpack.i.h.bf16 %v2671_v56  ;;  %v2672_v10 = vunpack.i.l.bf16 %v2671_v56 }
 0x2fa   : > { %v1598_v1 = vsel %vm649_vm1, %v3540_v26, %v2673_v37  ;;  %v1597_v11 = vsel %vm649_vm1, %v3538_v60, %v2672_v10  ;;  %v1599_v26 = vsel %vm649_vm1, %v3548_v32, %v2682_v7 }
 0x305   : > { %2327 = vmatmul.msk.bf16.gmra.mxu2 %vm718_vm3, %v1625_v13 }
 0x30f   : > { %v2676_v0 = vpop.permute.xlu1 %2675 }
 0x310   : > { %v2678_v9 = vunpack.i.h.bf16 %v2676_v0  ;;  %v2677_v63 = vunpack.i.l.bf16 %v2676_v0 }
 0x312   : > { %v1613_v3 = vsel %vm674_vm2, %v1597_v11, %v2677_v63  ;;  %v1614_v18 = vsel %vm674_vm2, %v1598_v1, %v2678_v9 }
 0x313   : > { %v1626_v55 = vpack.c.bf16 %v1614_v18, %v1613_v3 }
 0x315   : > { %2328 = vmatmul.msk.bf16.gmra.mxu2 %vm718_vm3, %v1626_v55 }
 0x317   : > { %v2691_v42 = vpop.permute.xlu1 %2690  ;;  %v2696_v15 = vpop.permute.xlu2 %2695 }
 0x318   : > { %v2693_v12 = vunpack.i.h.bf16 %v2691_v42  ;;  %v2692_v23 = vunpack.i.l.bf16 %v2691_v42  ;;  %v2698_v29 = vunpack.i.h.bf16 %v2696_v15  ;;  %v2697_v2 = vunpack.i.l.bf16 %v2696_v15 }
 0x31a   : > { %v1602_v4 = vsel %vm649_vm1, %v3561_v50, %v2693_v12  ;;  %v1601_v16 = vsel %vm649_vm1, %v3559_v19, %v2692_v23 }
 0x31b   : > { %v1617_v32 = vsel %vm674_vm2, %v1601_v16, %v2697_v2  ;;  %v1618_v8 = vsel %vm674_vm2, %v1602_v4, %v2698_v29 }
 0x31c   : > { %v1628_v20 = vpack.c.bf16 %v1618_v8, %v1617_v32 }
 0x31f   : > { %v2686_v41 = vpop.permute.xlu0 %2685  ;;  %v2711_v39 = vpop.permute.xlu2 %2710 }
 0x320   : > { %v2688_v14 = vunpack.i.h.bf16 %v2686_v41  ;;  %v2687_v59 = vunpack.i.l.bf16 %v2686_v41  ;;  %v2713_v43 = vunpack.i.h.bf16 %v2711_v39  ;;  %v2712_v33 = vunpack.i.l.bf16 %v2711_v39 }
 0x322   : > { %v1615_v60 = vsel %vm674_vm2, %v1599_v26, %v2687_v59  ;;  %v1616_v25 = vsel %vm674_vm2, %v1600_v62, %v2688_v14  ;;  %v1606_v53 = vsel %vm649_vm1, %v3585_v61, %v2713_v43 }
 0x323   : > { %v1627_v30 = vpack.c.bf16 %v1616_v25, %v1615_v60 }
 0x325   : > { %2329 = vmatmul.msk.bf16.gmra.mxu2 %vm718_vm3, %v1627_v30 }
 0x327   : > { %v2701_v27 = vpop.permute.xlu0 %2700 }
 0x328   : > { %v2703_v47 = vunpack.i.h.bf16 %v2701_v27  ;;  %v2702_v6 = vunpack.i.l.bf16 %v2701_v27 }
 0x32a   : > { %v1604_v5 = vsel %vm649_vm1, %v3572_v44, %v2703_v47  ;;  %v1603_v50 = vsel %vm649_vm1, %v3570_v57, %v2702_v6  ;;  %v1605_v44 = vsel %vm649_vm1, %v3583_v21, %v2712_v33 }
 0x335   : > { %2330 = vmatmul.msk.bf16.gmra.mxu2 %vm718_vm3, %v1628_v20 }
 0x33a   : > { %v2706_v45 = vpop.permute.xlu1 %2705 }
 0x33b   : > { %v2708_v38 = vunpack.i.h.bf16 %v2706_v45  ;;  %v2707_v17 = vunpack.i.l.bf16 %v2706_v45 }
 0x33d   : > { %v1619_v19 = vsel %vm674_vm2, %v1603_v50, %v2707_v17  ;;  %v1620_v28 = vsel %vm674_vm2, %v1604_v5, %v2708_v38 }
 0x33e   : > { %v1629_v34 = vpack.c.bf16 %v1620_v28, %v1619_v19 }
 0x345   : > { %2331 = vmatmul.msk.bf16.gmra.mxu2 %vm718_vm3, %v1629_v34 }
 0x34a   : > { %v2716_v52 = vpop.permute.xlu0 %2715 }
 0x34b   : > { %v2718_v46 = vunpack.i.h.bf16 %v2716_v52  ;;  %v2717_v22 = vunpack.i.l.bf16 %v2716_v52 }
 0x34d   : > { %v1621_v57 = vsel %vm674_vm2, %v1605_v44, %v2717_v22  ;;  %v1622_v24 = vsel %vm674_vm2, %v1606_v53, %v2718_v46 }
 0x34e   : > { %v1630_v54 = vpack.c.bf16 %v1622_v24, %v1621_v57 }
 0x355   : > { %2332 = vmatmul.msk.bf16.gmra.mxu2 %vm718_vm3, %v1630_v54 }
 0x368   : > { %v1674_v36 = vpop.f32.mrf.mxu2 }
 0x369   : > { %v1718_v49 = vadd.f32 %v3678_v31, %v1674_v36 }
 0x36b   : > { %v3681_v48 = vmax.f32 %v1718_v49, 0.0 }
 0x36d   : > { %v1767_v51 = vrot.slane %v3681_v48, 6  ;;  %v1815_v13 = vrot.slane %v3681_v48, 2 }
 0x370   : > { %v1676_v61 = vpop.f32.mrf.mxu2 }
 0x371   : > { %v1719_v21 = vadd.f32 %v3678_v31, %v1676_v61 }
 0x373   : > { %v1735_v35 = vmax.f32 %v1719_v21, 0.0 }
 0x375   : > { %v1768_v56 = vrot.slane %v1735_v35, 6  ;;  %v1816_v37 = vrot.slane %v1735_v35, 2  ;;  %v2719_v10 = vpack.i.bf16 %v1735_v35, %v3681_v48 }
 0x377   : > { %2720 = vrot.lane.b32.xlu1 %v2719_v10, %s2859_s29  ;;  %v1817_v0 = vsel %vm755_vm0, %v1815_v13, %v1816_v37  ;;  %v1847_v9 = vsel %vm755_vm0, %v1816_v37, 0.0  ;;  %v3693_v63 = vsel %vm1766_vm12, %v1767_v51, %v1768_v56  ;;  %v2335_v10 = vld [vmem:[%s3987_s8] sm:$0xf] }
 0x378   : > { %v1679_v1 = vpop.f32.mrf.mxu2  ;;  %v2724_v11 = vpack.i.bf16 %v1847_v9, %v1817_v0  ;;  %v2352_v0 = vld [vmem:[%s3987_s8] sm:$0x30] }
 0x379   : > { %v1720_v3 = vadd.f32 %v3678_v31, %v1679_v1  ;;  %v2336_v9 = vor.u32 %v2352_v0, %v2335_v10 }
 0x37a   : > { %2725 = vrot.lane.b32.xlu2 %v2724_v11, %s2860_s11 }
 0x37b   : > { %v3697_v18 = vmax.f32 %v1720_v3, 0.0 }
 0x37d   : > { %v1770_v7 = vrot.slane %v3697_v18, 6  ;;  %v1818_v41 = vrot.slane %v3697_v18, 2 }
 0x380   : > { %v1681_v55 = vpop.f32.mrf.mxu2 }
 0x381   : > { %v1721_v40 = vadd.f32 %v3678_v31, %v1681_v55 }
 0x383   : > { %v1737_v58 = vmax.f32 %v1721_v40, 0.0 }
 0x385   : > { %v1771_v14 = vrot.slane %v1737_v58, 6  ;;  %v1819_v59 = vrot.slane %v1737_v58, 2  ;;  %v2729_v62 = vpack.i.bf16 %v1737_v58, %v3697_v18  ;;  %v2031_v58 = vsel %vm755_vm0, %v2336_v9, 0 }
 0x386   : > { %2040 = vmatpush.bf16.msrb.mxu3 %v2031_v58  ;;  %v1807_v58 = vsel %vm1766_vm12, 0.0, %v1767_v51  ;;  %v1808_v51 = vsel %vm1766_vm12, 0.0, %v1770_v7 }
 0x387   : > { %2730 = vrot.lane.b32.xlu0 %v2729_v62, %s2859_s29  ;;  %v1820_v26 = vsel %vm755_vm0, %v1818_v41, %v1819_v59  ;;  %v1848_v60 = vsel %vm755_vm0, %v1819_v59, 0.0  ;;  %v3709_v25 = vsel %vm1766_vm12, %v1770_v7, %v1771_v14 }
 0x388   : > { %v1684_v30 = vpop.f32.mrf.mxu2  ;;  %v2734_v42 = vpack.i.bf16 %v1848_v60, %v1820_v26 }
 0x389   : > { %v1722_v12 = vadd.f32 %v3678_v31, %v1684_v30 }
 0x38a   : > { %2735 = vrot.lane.b32.xlu1 %v2734_v42, %s2860_s11 }
 0x38b   : > { %v3713_v23 = vmax.f32 %v1722_v12, 0.0 }
 0x38d   : > { %v1773_v4 = vrot.slane %v3713_v23, 6  ;;  %v1821_v16 = vrot.slane %v3713_v23, 2 }
 0x38f   : > { %v1809_v7 = vsel %vm1766_vm12, 0.0, %v1773_v4 }
 0x390   : > { %v1686_v15 = vpop.f32.mrf.mxu2 }
 0x391   : > { %v1723_v29 = vadd.f32 %v3678_v31, %v1686_v15 }
 0x393   : > { %v1739_v2 = vmax.f32 %v1723_v29, 0.0 }
 0x395   : > { %v1774_v32 = vrot.slane %v1739_v2, 6  ;;  %v1822_v8 = vrot.slane %v1739_v2, 2  ;;  %v2739_v20 = vpack.i.bf16 %v1739_v2, %v3713_v23 }
 0x397   : > { %2740 = vrot.lane.b32.xlu2 %v2739_v20, %s2859_s29  ;;  %v1823_v27 = vsel %vm755_vm0, %v1821_v16, %v1822_v8  ;;  %v1849_v45 = vsel %vm755_vm0, %v1822_v8, 0.0  ;;  %v3725_v47 = vsel %vm1766_vm12, %v1773_v4, %v1774_v32 }
 0x398   : > { %v1689_v6 = vpop.f32.mrf.mxu2  ;;  %v2744_v38 = vpack.i.bf16 %v1849_v45, %v1823_v27 }
 0x399   : > { %v1724_v17 = vadd.f32 %v3678_v31, %v1689_v6 }
 0x39a   : > { %2745 = vrot.lane.b32.xlu0 %v2744_v38, %s2860_s11 }
 0x39b   : > { %v3729_v5 = vmax.f32 %v1724_v17, 0.0 }
 0x39d   : > { %v1776_v34 = vrot.slane %v3729_v5, 6  ;;  %v1824_v39 = vrot.slane %v3729_v5, 2 }
 0x39f   : > { %v1810_v4 = vsel %vm1766_vm12, 0.0, %v1776_v34 }
 0x3a0   : > { %v1691_v50 = vpop.f32.mrf.mxu2 }
 0x3a1   : > { %v1725_v19 = vadd.f32 %v3678_v31, %v1691_v50 }
 0x3a3   : > { %v1741_v28 = vmax.f32 %v1725_v19, 0.0 }
 0x3a5   : > { %v1777_v52 = vrot.slane %v1741_v28, 6  ;;  %v1825_v43 = vrot.slane %v1741_v28, 2  ;;  %v2749_v33 = vpack.i.bf16 %v1741_v28, %v3729_v5 }
 0x3a7   : > { %2750 = vrot.lane.b32.xlu1 %v2749_v33, %s2859_s29  ;;  %v1826_v46 = vsel %vm755_vm0, %v1824_v39, %v1825_v43  ;;  %v1850_v22 = vsel %vm755_vm0, %v1825_v43, 0.0  ;;  %v3741_v53 = vsel %vm1766_vm12, %v1776_v34, %v1777_v52 }
 0x3a8   : > { %v1694_v44 = vpop.f32.mrf.mxu2  ;;  %v2754_v57 = vpack.i.bf16 %v1850_v22, %v1826_v46 }
 0x3a9   : > { %v1726_v24 = vadd.f32 %v3678_v31, %v1694_v44 }
 0x3aa   : > { %2755 = vrot.lane.b32.xlu2 %v2754_v57, %s2860_s11 }
 0x3ab   : > { %v3745_v54 = vmax.f32 %v1726_v24, 0.0 }
 0x3ad   : > { %v1779_v21 = vrot.slane %v3745_v54, 6  ;;  %v1827_v35 = vrot.slane %v3745_v54, 2 }
 0x3af   : > { %v1811_v34 = vsel %vm1766_vm12, 0.0, %v1779_v21 }
 0x3b0   : > { %v1696_v36 = vpop.f32.mrf.mxu2 }
 0x3b1   : > { %v1727_v49 = vadd.f32 %v3678_v31, %v1696_v36 }
 0x3b3   : > { %v1743_v61 = vmax.f32 %v1727_v49, 0.0 }
 0x3b5   : > { %v1780_v13 = vrot.slane %v1743_v61, 6  ;;  %v1828_v56 = vrot.slane %v1743_v61, 2  ;;  %v2759_v37 = vpack.i.bf16 %v1743_v61, %v3745_v54 }
 0x3b7   : > { %2760 = vrot.lane.b32.xlu0 %v2759_v37, %s2859_s29  ;;  %v1829_v1 = vsel %vm755_vm0, %v1827_v35, %v1828_v56  ;;  %v1851_v11 = vsel %vm755_vm0, %v1828_v56, 0.0  ;;  %v3763_v3 = vsel %vm1766_vm12, %v1779_v21, %v1780_v13 }
 0x3b8   : > { %v1699_v55 = vpop.f32.mrf.mxu2  ;;  %v2764_v40 = vpack.i.bf16 %v1851_v11, %v1829_v1 }
 0x3b9   : > { %v1728_v41 = vadd.f32 %v3678_v31, %v1699_v55 }
 0x3ba   : > { %2765 = vrot.lane.b32.xlu1 %v2764_v40, %s2860_s11 }
 0x3bb   : > { %v3768_v14 = vmax.f32 %v1728_v41, 0.0 }
 0x3bd   : > { %v1782_v60 = vrot.slane %v3768_v14, 6  ;;  %v1830_v30 = vrot.slane %v3768_v14, 2 }
 0x3bf   : > { %v1812_v21 = vsel %vm1766_vm12, 0.0, %v1782_v60 }
 0x3c0   : > { %v1701_v59 = vpop.f32.mrf.mxu2 }
 0x3c1   : > { %v1729_v62 = vadd.f32 %v3678_v31, %v1701_v59 }
 0x3c3   : > { %v1745_v26 = vmax.f32 %v1729_v62, 0.0 }
 0x3c5   : > { %v1783_v42 = vrot.slane %v1745_v26, 6  ;;  %v1831_v12 = vrot.slane %v1745_v26, 2  ;;  %v2769_v15 = vpack.i.bf16 %v1745_v26, %v3768_v14 }
 0x3c7   : > { %2770 = vrot.lane.b32.xlu2 %v2769_v15, %s2859_s29  ;;  %v1832_v29 = vsel %vm755_vm0, %v1830_v30, %v1831_v12  ;;  %v1852_v2 = vsel %vm755_vm0, %v1831_v12, 0.0  ;;  %v3780_v16 = vsel %vm1766_vm12, %v1782_v60, %v1783_v42 }
 0x3c8   : > { %v1704_v32 = vpop.f32.mrf.mxu2  ;;  %v2774_v8 = vpack.i.bf16 %v1852_v2, %v1832_v29 }
 0x3c9   : > { %v1730_v20 = vadd.f32 %v3678_v31, %v1704_v32 }
 0x3ca   : > { %2775 = vrot.lane.b32.xlu0 %v2774_v8, %s2860_s11 }
 0x3cb   : > { %v3784_v45 = vmax.f32 %v1730_v20, 0.0 }
 0x3cd   : > { %v1785_v17 = vrot.slane %v3784_v45, 6  ;;  %v1833_v50 = vrot.slane %v3784_v45, 2 }
 0x3cf   : > { %v1813_v60 = vsel %vm1766_vm12, 0.0, %v1785_v17 }
 0x3d0   : > { %v1706_v27 = vpop.f32.mrf.mxu2 }
 0x3d1   : > { %v1731_v6 = vadd.f32 %v3678_v31, %v1706_v27 }
 0x3d3   : > { %v1747_v38 = vmax.f32 %v1731_v6, 0.0 }
 0x3d5   : > { %v1786_v19 = vrot.slane %v1747_v38, 6  ;;  %v1834_v28 = vrot.slane %v1747_v38, 2  ;;  %v2779_v39 = vpack.i.bf16 %v1747_v38, %v3784_v45 }
 0x3d7   : > { %v1835_v52 = vsel %vm755_vm0, %v1833_v50, %v1834_v28  ;;  %v1853_v43 = vsel %vm755_vm0, %v1834_v28, 0.0  ;;  %v3795_v33 = vsel %vm1766_vm12, %v1785_v17, %v1786_v19  ;;  %2780 = vrot.lane.b32.xlu1 %v2779_v39, %s2859_s29 }
 0x3d8   : > { %v1709_v46 = vpop.f32.mrf.mxu2  ;;  %v2784_v22 = vpack.i.bf16 %v1853_v43, %v1835_v52 }
 0x3d9   : > { %v1732_v44 = vadd.f32 %v3678_v31, %v1709_v46 }
 0x3da   : > { %2785 = vrot.lane.b32.xlu2 %v2784_v22, %s2860_s11 }
 0x3db   : > { %v3800_v57 = vmax.f32 %v1732_v44, 0.0 }
 0x3dd   : > { %v1788_v61 = vrot.slane %v3800_v57, 6  ;;  %v1836_v35 = vrot.slane %v3800_v57, 2 }
 0x3e0   : > { %v1711_v24 = vpop.f32.mrf.mxu2 }
 0x3e1   : > { %v1733_v36 = vadd.f32 %v3678_v31, %v1711_v24  ;;  %v2726_v31 = vpop.permute.xlu2 %2725 }
 0x3e2   : > { %v2728_v41 = vunpack.i.h.bf16 %v2726_v31  ;;  %v2727_v59 = vunpack.i.l.bf16 %v2726_v31 }
 0x3e3   : > { %v1749_v49 = vmax.f32 %v1733_v36, 0.0 }
 0x3e5   : > { %v1789_v13 = vrot.slane %v1749_v49, 6  ;;  %v1837_v56 = vrot.slane %v1749_v49, 2  ;;  %v2789_v37 = vpack.i.bf16 %v1749_v49, %v3800_v57  ;;  %v3893_v57 = vld [vmem:[%s3988_s9] ss:$0 sm:$0xff] }
 0x3e7   : > { %2790 = vrot.lane.b32.xlu0 %v2789_v37, %s2859_s29  ;;  %v1838_v10 = vsel %vm755_vm0, %v1836_v35, %v1837_v56  ;;  %v1854_v0 = vsel %vm755_vm0, %v1837_v56, 0.0  ;;  %v3812_v9 = vsel %vm1766_vm12, %v1788_v61, %v1789_v13  ;;  %s2282_s29 = sshll.u32 %s4005_s20, 1 }
 0x3e8   : > { %v2794_v1 = vpack.i.bf16 %v1854_v0, %v1838_v10 }
 0x3e9   : > { %v2721_v11 = vpop.permute.xlu1 %2720 }
 0x3ea   : > { %v2723_v55 = vunpack.i.h.bf16 %v2721_v11  ;;  %v2722_v40 = vunpack.i.l.bf16 %v2721_v11  ;;  %2795 = vrot.lane.b32.xlu1 %v2794_v1, %s2860_s11  ;;  %s2283_s11 = sshll.u32 %s4001_s14, 5 }
 0x3eb   : > { %s446_s23 = sadd.s32 %s2283_s11, %s2282_s29 }
 0x3ec   : > { %v1959_v62 = vsel %vm649_vm1, %v1807_v58, %v2722_v40  ;;  %v1960_v26 = vsel %vm649_vm1, %v3693_v63, %v2723_v55  ;;  %s2284_s24 = sshll.u32 %s446_s23, 3 }
 0x3ed   : > { %v1975_v30 = vsel %vm674_vm2, %v1959_v62, %v2727_v59  ;;  %v1976_v42 = vsel %vm674_vm2, %v1960_v26, %v2728_v41  ;;  %s3900_s27 = scalar_lea.vmem %s3989_s10, %s2284_s24 }
 0x3ee   : > { %v1991_v12 = vpack.c.bf16 %v1976_v42, %v1975_v30 }
 0x3f0   : > { %2337 = vmatmul.msk.bf16.vlgmr.msrb.gmra.mxu3 %vm718_vm3, %v1991_v12 }
 0x3f1   : > { %v2741_v50 = vpop.permute.xlu2 %2740 }
 0x3f2   : > { %v2743_v19 = vunpack.i.h.bf16 %v2741_v50  ;;  %v2742_v28 = vunpack.i.l.bf16 %v2741_v50 }
 0x3f4   : > { %v1963_v43 = vsel %vm649_vm1, %v1809_v7, %v2742_v28  ;;  %v1814_v7 = vsel %vm1766_vm12, 0.0, %v1788_v61 }
 0x3f9   : > { %v2731_v15 = vpop.permute.xlu0 %2730 }
 0x3fa   : > { %v2733_v29 = vunpack.i.h.bf16 %v2731_v15  ;;  %v2732_v2 = vunpack.i.l.bf16 %v2731_v15 }
 0x3fc   : > { %v2736_v48 = vpop.permute.xlu1 %2735  ;;  %v1962_v63 = vsel %vm649_vm1, %v3709_v25, %v2733_v29  ;;  %v1961_v20 = vsel %vm649_vm1, %v1808_v51, %v2732_v2  ;;  %v1964_v25 = vsel %vm649_vm1, %v3725_v47, %v2743_v19 }
 0x3fd   : > { %v2738_v32 = vunpack.i.h.bf16 %v2736_v48  ;;  %v2737_v8 = vunpack.i.l.bf16 %v2736_v48 }
 0x3ff   : > { %v1977_v27 = vsel %vm674_vm2, %v1961_v20, %v2737_v8  ;;  %v1978_v6 = vsel %vm674_vm2, %v1962_v63, %v2738_v32 }
 0x400   : > { %v1992_v38 = vpack.c.bf16 %v1978_v6, %v1977_v27 }
 0x402   : > { %2338 = vmatmul.msk.bf16.gmra.mxu3 %vm718_vm3, %v1992_v38 }
 0x404   : > { %v2756_v24 = vpop.permute.xlu2 %2755 }
 0x405   : > { %v2758_v35 = vunpack.i.h.bf16 %v2756_v24  ;;  %v2757_v13 = vunpack.i.l.bf16 %v2756_v24 }
 0x40c   : > { %v2746_v18 = vpop.permute.xlu0 %2745 }
 0x40d   : > { %v2748_v39 = vunpack.i.h.bf16 %v2746_v18  ;;  %v2747_v52 = vunpack.i.l.bf16 %v2746_v18 }
 0x40f   : > { %v1979_v46 = vsel %vm674_vm2, %v1963_v43, %v2747_v52  ;;  %v1980_v22 = vsel %vm674_vm2, %v1964_v25, %v2748_v39 }
 0x410   : > { %v1993_v44 = vpack.c.bf16 %v1980_v22, %v1979_v46 }
 0x412   : > { %2339 = vmatmul.msk.bf16.gmra.mxu3 %vm718_vm3, %v1993_v44  ;;  %v2803_v44 = vld [vmem:[%s2959_s28 + $0x30] sm:$0xff] }
 0x419   : > { %v2751_v36 = vpop.permute.xlu1 %2750 }
 0x41a   : > { %v2753_v49 = vunpack.i.h.bf16 %v2751_v36  ;;  %v2752_v23 = vunpack.i.l.bf16 %v2751_v36 }
 0x41c   : > { %v1965_v47 = vsel %vm649_vm1, %v1810_v4, %v2752_v23  ;;  %v1966_v56 = vsel %vm649_vm1, %v3741_v53, %v2753_v49  ;;  %v2804_v4 = vld [vmem:[%s2959_s28 + $0x38] sm:$0xff] }
 0x41d   : > { %v1981_v37 = vsel %vm674_vm2, %v1965_v47, %v2757_v13  ;;  %v1982_v10 = vsel %vm674_vm2, %v1966_v56, %v2758_v35 }
 0x41e   : > { %v1994_v0 = vpack.c.bf16 %v1982_v10, %v1981_v37  ;;  %v2805_v37 = vld [vmem:[%s2959_s28 + $0x40] sm:$0xff] }
 0x421   : > { %v2771_v26 = vpop.permute.xlu2 %2770 }
 0x422   : > { %2340 = vmatmul.msk.bf16.gmra.mxu3 %vm718_vm3, %v1994_v0  ;;  %v2773_v30 = vunpack.i.h.bf16 %v2771_v26  ;;  %v2772_v42 = vunpack.i.l.bf16 %v2771_v26  ;;  %v2808_v26 = vld [vmem:[%s2959_s28 + $0x58] sm:$0xff] }
 0x424   : > { %v1970_v29 = vsel %vm649_vm1, %v3780_v16, %v2773_v30 }
 0x429   : > { %v2761_v31 = vpop.permute.xlu0 %2760 }
 0x42a   : > { %v2763_v1 = vunpack.i.h.bf16 %v2761_v31  ;;  %v2762_v11 = vunpack.i.l.bf16 %v2761_v31 }
 0x42c   : > { %v2766_v5 = vpop.permute.xlu1 %2765  ;;  %v1968_v53 = vsel %vm649_vm1, %v3763_v3, %v2763_v1  ;;  %v1967_v58 = vsel %vm649_vm1, %v1811_v34, %v2762_v11  ;;  %v1969_v3 = vsel %vm649_vm1, %v1812_v21, %v2772_v42  ;;  %v2806_v11 = vld [vmem:[%s2959_s28 + $0x48] sm:$0xff] }
 0x42d   : > { %v2768_v55 = vunpack.i.h.bf16 %v2766_v5  ;;  %v2767_v40 = vunpack.i.l.bf16 %v2766_v5 }
 0x42f   : > { %v1983_v41 = vsel %vm674_vm2, %v1967_v58, %v2767_v40  ;;  %v1984_v59 = vsel %vm674_vm2, %v1968_v53, %v2768_v55  ;;  %v2807_v53 = vld [vmem:[%s2959_s28 + $0x50] sm:$0xff] }
 0x430   : > { %v1995_v62 = vpack.c.bf16 %v1984_v59, %v1983_v41 }
 0x432   : > { %2341 = vmatmul.msk.bf16.gmra.mxu3 %vm718_vm3, %v1995_v62 }
 0x434   : > { %v2786_v32 = vpop.permute.xlu2 %2785 }
 0x435   : > { %v2788_v20 = vunpack.i.h.bf16 %v2786_v32  ;;  %v2787_v27 = vunpack.i.l.bf16 %v2786_v32 }
 0x43c   : > { %v2776_v54 = vpop.permute.xlu0 %2775 }
 0x43d   : > { %v2778_v12 = vunpack.i.h.bf16 %v2776_v54  ;;  %v2777_v15 = vunpack.i.l.bf16 %v2776_v54 }
 0x43f   : > { %v1985_v2 = vsel %vm674_vm2, %v1969_v3, %v2777_v15  ;;  %v1986_v48 = vsel %vm674_vm2, %v1970_v29, %v2778_v12  ;;  %v2809_v12 = vld [vmem:[%s2959_s28 + $0x60] sm:$0xff] }
 0x440   : > { %v1996_v51 = vpack.c.bf16 %v1986_v48, %v1985_v2  ;;  %v2810_v48 = vld [vmem:[%s2959_s28 + $0x68] sm:$0xff] }
 0x442   : > { %2342 = vmatmul.msk.bf16.gmra.mxu3 %vm718_vm3, %v1996_v51 }
 0x449   : > { %v2781_v8 = vpop.permute.xlu1 %2780 }
 0x44a   : > { %v2783_v63 = vunpack.i.h.bf16 %v2781_v8  ;;  %v2782_v14 = vunpack.i.l.bf16 %v2781_v8 }
 0x44c   : > { %v1971_v6 = vsel %vm649_vm1, %v1813_v60, %v2782_v14  ;;  %v1972_v16 = vsel %vm649_vm1, %v3795_v33, %v2783_v63  ;;  %v2811_v14 = vld [vmem:[%s2959_s28 + $0x70] sm:$0xff] }
 0x44d   : > { %v1987_v38 = vsel %vm674_vm2, %v1971_v6, %v2787_v27  ;;  %v1988_v50 = vsel %vm674_vm2, %v1972_v16, %v2788_v20  ;;  %v2812_v16 = vld [vmem:[%s2959_s28 + $0x78] sm:$0xff] }
 0x44e   : > { %v1997_v19 = vpack.c.bf16 %v1988_v50, %v1987_v38 }
 0x452   : > { %2343 = vmatmul.msk.bf16.gmra.mxu3 %vm718_vm3, %v1997_v19 }
 0x459   : > { %v2791_v28 = vpop.permute.xlu0 %2790 }
 0x45a   : > { %v2793_v45 = vunpack.i.h.bf16 %v2791_v28  ;;  %v2792_v17 = vunpack.i.l.bf16 %v2791_v28 }
 0x45c   : > { %v2796_v18 = vpop.permute.xlu1 %2795  ;;  %v1973_v52 = vsel %vm649_vm1, %v1814_v7, %v2792_v17  ;;  %v1974_v25 = vsel %vm649_vm1, %v3812_v9, %v2793_v45  ;;  %v2813_v45 = vld [vmem:[%s3032_s25] sm:$0xff] }
 0x45d   : > { %v2798_v39 = vunpack.i.h.bf16 %v2796_v18  ;;  %v2797_v33 = vunpack.i.l.bf16 %v2796_v18 }
 0x45f   : > { %v1989_v43 = vsel %vm674_vm2, %v1973_v52, %v2797_v33  ;;  %v1990_v46 = vsel %vm674_vm2, %v1974_v25, %v2798_v39  ;;  %v2814_v33 = vld [vmem:[%s3032_s25 + $0x8] sm:$0xff] }
 0x460   : > { %v1998_v22 = vpack.c.bf16 %v1990_v46, %v1989_v43 }
 0x462   : > { %2344 = vmatmul.msk.bf16.gmra.mxu3 %vm718_vm3, %v1998_v22  ;;  %v2815_v22 = vld [vmem:[%s3032_s25 + $0x10] sm:$0xff] }
 0x473   : > { %v2042_v61 = vpop.f32.mrf.mxu3 }
 0x474   : > { %v2086_v9 = vadd.f32 %v3893_v57, %v2042_v61 }
 0x476   : > { %v2102_v24 = vadd.f32 %v2803_v44, %v2086_v9 }
 0x478   : > { %v2118_v36 = vmax.f32 %v2102_v24, 0.0 }
 0x47a   : > { %2134 = vst.msk [vmem:[%s3900_s27] sm:$0xff] %vm649_vm1, %v2118_v36  ;;  %v2816_v36 = vld [vmem:[%s3032_s25 + $0x18] sm:$0xff] }
 0x47b   : > { %v2044_v49 = vpop.f32.mrf.mxu3 }
 0x47c   : > { %v2087_v23 = vadd.f32 %v3893_v57, %v2044_v49 }
 0x47e   : > { %v2103_v35 = vadd.f32 %v2804_v4, %v2087_v23 }
 0x480   : > { %v2119_v13 = vmax.f32 %v2103_v35, 0.0 }
 0x482   : > { %2135 = vst.msk [vmem:[%s3900_s27 + $0x8] sm:$0xff] %vm649_vm1, %v2119_v13  ;;  %v2817_v13 = vld [vmem:[%s3032_s25 + $0x20] sm:$0xff] }
 0x485   : > { %v2047_v47 = vpop.f32.mrf.mxu3 }
 0x486   : > { %v2088_v56 = vadd.f32 %v3893_v57, %v2047_v47 }
 0x488   : > { %v2104_v10 = vadd.f32 %v2805_v37, %v2088_v56 }
 0x48a   : > { %v2120_v0 = vmax.f32 %v2104_v10, 0.0 }
 0x48c   : > { %2136 = vst.msk [vmem:[%s3900_s27 + $0x10] sm:$0xff] %vm649_vm1, %v2120_v0  ;;  %v2818_v0 = vld [vmem:[%s3032_s25 + $0x28] sm:$0xff] }
 0x48d   : > { %v2049_v31 = vpop.f32.mrf.mxu3 }
 0x48e   : > { %v2089_v1 = vadd.f32 %v3893_v57, %v2049_v31 }
 0x490   : > { %v2105_v5 = vadd.f32 %v2806_v11, %v2089_v1 }
 0x492   : > { %v2121_v34 = vmax.f32 %v2105_v5, 0.0 }
 0x494   : > { %2137 = vst.msk [vmem:[%s3900_s27 + $0x18] sm:$0xff] %vm649_vm1, %v2121_v34 }
 0x495   : > { %v2052_v55 = vpop.f32.mrf.mxu3 }
 0x496   : > { %v2090_v40 = vadd.f32 %v3893_v57, %v2052_v55 }
 0x498   : > { %v2106_v58 = vadd.f32 %v2807_v53, %v2090_v40 }
 0x49a   : > { %v2122_v41 = vmax.f32 %v2106_v58, 0.0 }
 0x49c   : > { %2138 = vst.msk [vmem:[%s3900_s27 + $0x20] sm:$0xff] %vm649_vm1, %v2122_v41 }
 0x49d   : > { %v2054_v59 = vpop.f32.mrf.mxu3 }
 0x49e   : > { %v2091_v62 = vadd.f32 %v3893_v57, %v2054_v59 }
 0x4a0   : > { %v2107_v30 = vadd.f32 %v2808_v26, %v2091_v62 }
 0x4a2   : > { %v2123_v42 = vmax.f32 %v2107_v30, 0.0 }
 0x4a4   : > { %2139 = vst.msk [vmem:[%s3900_s27 + $0x28] sm:$0xff] %vm649_vm1, %v2123_v42 }
 0x4a5   : > { %v2057_v54 = vpop.f32.mrf.mxu3 }
 0x4a6   : > { %v2092_v21 = vadd.f32 %v3893_v57, %v2057_v54 }
 0x4a8   : > { %v2108_v15 = vadd.f32 %v2809_v12, %v2092_v21 }
 0x4aa   : > { %v2124_v3 = vmax.f32 %v2108_v15, 0.0 }
 0x4ac   : > { %2140 = vst.msk [vmem:[%s3900_s27 + $0x30] sm:$0xff] %vm649_vm1, %v2124_v3 }
 0x4ad   : > { %v2059_v29 = vpop.f32.mrf.mxu3 }
 0x4ae   : > { %v2093_v2 = vadd.f32 %v3893_v57, %v2059_v29 }
 0x4b0   : > { %v2109_v51 = vadd.f32 %v2810_v48, %v2093_v2 }
 0x4b2   : > { %v2125_v32 = vmax.f32 %v2109_v51, 0.0 }
 0x4b4   : > { %2141 = vst.msk [vmem:[%s3900_s27 + $0x38] sm:$0xff] %vm649_vm1, %v2125_v32 }
 0x4b5   : > { %v2062_v8 = vpop.f32.mrf.mxu3 }
 0x4b6   : > { %v2094_v63 = vadd.f32 %v3893_v57, %v2062_v8 }
 0x4b8   : > { %v2110_v60 = vadd.f32 %v2811_v14, %v2094_v63 }
 0x4ba   : > { %v2126_v20 = vmax.f32 %v2110_v60, 0.0 }
 0x4bc   : > { %2142 = vst.msk [vmem:[%s3900_s27 + $0x40] sm:$0xff] %vm649_vm1, %v2126_v20 }
 0x4bd   : > { %v2064_v27 = vpop.f32.mrf.mxu3 }
 0x4be   : > { %v2095_v6 = vadd.f32 %v3893_v57, %v2064_v27 }
 0x4c0   : > { %v2111_v38 = vadd.f32 %v2812_v16, %v2095_v6 }
 0x4c2   : > { %v2127_v50 = vmax.f32 %v2111_v38, 0.0 }
 0x4c4   : > { %2143 = vst.msk [vmem:[%s3900_s27 + $0x48] sm:$0xff] %vm649_vm1, %v2127_v50 }
 0x4c5   : > { %v2067_v19 = vpop.f32.mrf.mxu3 }
 0x4c6   : > { %v2096_v28 = vadd.f32 %v3893_v57, %v2067_v19 }
 0x4c8   : > { %v2112_v17 = vadd.f32 %v2813_v45, %v2096_v28 }
 0x4ca   : > { %v2128_v18 = vmax.f32 %v2112_v17, 0.0 }
 0x4cc   : > { %2144 = vst.msk [vmem:[%s3900_s27 + $0x50] sm:$0xff] %vm649_vm1, %v2128_v18 }
 0x4cd   : > { %v2069_v7 = vpop.f32.mrf.mxu3 }
 0x4ce   : > { %v2097_v39 = vadd.f32 %v3893_v57, %v2069_v7 }
 0x4d0   : > { %v2113_v52 = vadd.f32 %v2814_v33, %v2097_v39 }
 0x4d2   : > { %v2129_v25 = vmax.f32 %v2113_v52, 0.0 }
 0x4d4   : > { %2145 = vst.msk [vmem:[%s3900_s27 + $0x58] sm:$0xff] %vm649_vm1, %v2129_v25 }
 0x4d5   : > { %v2072_v43 = vpop.f32.mrf.mxu3 }
 0x4d6   : > { %v2098_v46 = vadd.f32 %v3893_v57, %v2072_v43 }
 0x4d8   : > { %v2114_v61 = vadd.f32 %v2815_v22, %v2098_v46 }
 0x4da   : > { %v2130_v9 = vmax.f32 %v2114_v61, 0.0 }
 0x4dc   : > { %2146 = vst.msk [vmem:[%s3900_s27 + $0x60] sm:$0xff] %vm649_vm1, %v2130_v9 }
 0x4dd   : > { %v2074_v44 = vpop.f32.mrf.mxu3 }
 0x4de   : > { %v2099_v24 = vadd.f32 %v3893_v57, %v2074_v44 }
 0x4e0   : > { %v2115_v49 = vadd.f32 %v2816_v36, %v2099_v24 }
 0x4e2   : > { %v2131_v23 = vmax.f32 %v2115_v49, 0.0 }
 0x4e4   : > { %2147 = vst.msk [vmem:[%s3900_s27 + $0x68] sm:$0xff] %vm649_vm1, %v2131_v23 }
 0x4e5   : > { %v2077_v4 = vpop.f32.mrf.mxu3 }
 0x4e6   : > { %v2100_v35 = vadd.f32 %v3893_v57, %v2077_v4 }
 0x4e8   : > { %v2116_v47 = vadd.f32 %v2817_v13, %v2100_v35 }
 0x4ea   : > { %v2132_v56 = vmax.f32 %v2116_v47, 0.0 }
 0x4ec   : > { %2148 = vst.msk [vmem:[%s3900_s27 + $0x70] sm:$0xff] %vm649_vm1, %v2132_v56 }
 0x4ed   : > { %v2079_v37 = vpop.f32.mrf.mxu3 }
 0x4ee   : > { %v2101_v10 = vadd.f32 %v3893_v57, %v2079_v37 }
 0x4f0   : > { %v2117_v31 = vadd.f32 %v2818_v0, %v2101_v10 }
 0x4f2   : > { %v2133_v1 = vmax.f32 %v2117_v31, 0.0 }
 0x4f4   : > { %2149 = vst.msk [vmem:[%s3900_s27 + $0x78] sm:$0xff] %vm649_vm1, %v2133_v1 }
 0x4f5 PF: > { %s20_s17 = sadd.s32 1, %s2857_s17   ;;  %s3990_s13 = smov %s2849_s15 }
 0x4f6   : > { %p17_p9 = scmp.ge.s32.totalorder %s20_s17, 6   ;;  %s3991_s14 = smov %s2853_s16 }
 0x4f7   : > { %s3992_s15 = smov %s3995_s18  ;;  %s3993_s16 = smov %s3999_s19 }
 0x4f8   :  { %19 = sbr.rel (!%p17_p9) target bundleno = 3 (0x3), region = 93 }

</bundles_post_ra>
